<compile_context>
chip_gen: v7x
topology: tpu7x:2x2x1
jax: 0.10.0
libtpu: 0.0.40
codegen_flags: <defaults>
</compile_context>

<pallas_src>
import jax
import jax.numpy as jnp
import numpy as np
from jax.experimental import pallas as pl
from jax.experimental.pallas import tpu as pltpu

EMBED_LEN = 50
HIDDEN_DIM = 75


def _round_up(x, m):
    return (x + m - 1) // m * m


def _pad_to(a, shape):
    return jnp.pad(a, [(0, s - d) for d, s in zip(a.shape, shape)])


def birnn_kernel(lens_ref, lmax_mask_ref, x_ref, wih_ref, whh_f_ref, whh_b_ref,
                 bf_ref, bb_ref, wl_ref, bl_ref, out_ref):
    B = lens_ref.shape[0]          # padded batch (multiple of 8)
    TB = x_ref.shape[0]            # T * B
    T = TB // B
    H = whh_f_ref.shape[0]         # padded hidden (128)

    lens = lens_ref[...]           # (B, 1) int32
    whh_f = whh_f_ref[...]
    whh_b = whh_b_ref[...]

    # --- hoisted input projection: one big MXU matmul, off the serial chain ---
    # x: (T*B, E_pad), wih: (E_pad, 2*H_pad) -> (T*B, 2*H_pad)
    x_proj = jnp.dot(x_ref[...], wih_ref[...],
                     preferred_element_type=jnp.float32)

    # --- hoisted bias broadcasts (not re-materialized per step) ---
    bf = jnp.broadcast_to(bf_ref[...], (B, H))
    bb = jnp.broadcast_to(bb_ref[...], (B, H))

    h_f = jnp.zeros((B, H), jnp.float32)
    h_b = jnp.zeros((B, H), jnp.float32)

    # --- fused, fully-unrolled bidirectional recurrence ---
    # forward uses timestep i, backward uses timestep T-1-i in the same
    # iteration; the two chains are independent and overlap.
    for i in range(T):
        tb = T - 1 - i
        xp_f = x_proj[i * B:(i + 1) * B, :H]        # forward input proj
        xp_b = x_proj[tb * B:(tb + 1) * B, H:]      # backward input proj
        hf_new = jnp.tanh(
            xp_f + jnp.dot(h_f, whh_f, preferred_element_type=jnp.float32) + bf)
        hb_new = jnp.tanh(
            xp_b + jnp.dot(h_b, whh_b, preferred_element_type=jnp.float32) + bb)
        h_f = jnp.where(i < lens, hf_new, h_f)      # packed-seq length masking
        h_b = jnp.where(tb < lens, hb_new, h_b)

    # pad_packed_sequence pads with zeros up to Lmax, so the forward output
    # read at position Lmax-1 is zero for shorter sequences.  The (lens==Lmax)
    # mask is precomputed in the wrapper.
    out_f = h_f * lmax_mask_ref[...]                # (B, H)

    # Linear on [out_f, h_b], done as a split matmul (no in-kernel concat).
    wl = wl_ref[...]                                # (2*H_pad, C_pad)
    out_ref[...] = (jnp.dot(out_f, wl[:H, :], preferred_element_type=jnp.float32)
                    + jnp.dot(h_b, wl[H:, :], preferred_element_type=jnp.float32)
                    + bl_ref[...])


def rnn_forward(params, inputs, inputs_len):
    """inputs: (B, T) int32 token ids; inputs_len: (B,) lengths."""
    E, H = EMBED_LEN, HIDDEN_DIM
    B, T = inputs.shape
    C = params["b_lin"].shape[-1]

    B_pad = _round_up(B, 8)
    E_pad = _round_up(E, 128)
    H_pad = _round_up(H, 128)
    C_pad = _round_up(C, 128)

    # Embedding lookup is glue (gather) done in plain JAX.
    emb = params["embedding"][inputs].astype(jnp.float32)        # (B, T, E)
    x = jnp.transpose(emb, (1, 0, 2))                            # (T, B, E) time-major
    x = jnp.pad(x, ((0, 0), (0, B_pad - B), (0, E_pad - E)))     # (T, B_pad, E_pad)
    x = x.reshape(T * B_pad, E_pad)                              # (T*B_pad, E_pad)

    lens = inputs_len.astype(jnp.int32)
    lens_pad = jnp.pad(lens, (0, B_pad - B)).reshape(B_pad, 1)   # padded rows -> len 0
    lmax_mask = (lens_pad == jnp.max(lens)).astype(jnp.float32)  # (B_pad, 1)

    # Input-projection weight, both directions side by side, zero-padded so
    # the forward block lives in cols [0, H_pad) and backward in [H_pad, 2*H_pad).
    wih_p = jnp.zeros((E_pad, 2 * H_pad), jnp.float32)
    wih_p = wih_p.at[:E, :H].set(params["wih_f"])
    wih_p = wih_p.at[:E, H_pad:H_pad + H].set(params["wih_b"])

    # Recurrent weights / biases zero-padded in both rows and cols so padded
    # hidden lanes stay exactly 0 (tanh(0) = 0) and never leak.
    whh_f_p = _pad_to(params["whh_f"], (H_pad, H_pad))
    whh_b_p = _pad_to(params["whh_b"], (H_pad, H_pad))
    bf_p = _pad_to(params["b_f"], (1, H_pad))
    bb_p = _pad_to(params["b_b"], (1, H_pad))

    # Linear layer: rows split the same way ([0,H_pad) fwd, [H_pad,2H_pad) bwd).
    wl = params["w_lin"]                                         # (2H, C)
    wl_p = jnp.zeros((2 * H_pad, C_pad), jnp.float32)
    wl_p = wl_p.at[:H, :C].set(wl[:H])
    wl_p = wl_p.at[H_pad:H_pad + H, :C].set(wl[H:])
    bl_p = _pad_to(params["b_lin"], (1, C_pad))

    vmem = pl.BlockSpec(memory_space=pltpu.MemorySpace.VMEM)
    out = pl.pallas_call(
        birnn_kernel,
        out_shape=jax.ShapeDtypeStruct((B_pad, C_pad), jnp.float32),
        in_specs=[vmem] * 10,
        out_specs=vmem,
    )(lens_pad, lmax_mask, x, wih_p, whh_f_p, whh_b_p, bf_p, bb_p, wl_p, bl_p)

    return out[:B, :C]


def make_params(key, vocab_size, num_classes):
    E, H = EMBED_LEN, HIDDEN_DIM
    ks = jax.random.split(key, 10)
    k_rnn = 1.0 / np.sqrt(H)
    k_lin = 1.0 / np.sqrt(2 * H)
    u = lambda k, shape, a: jax.random.uniform(k, shape, jnp.float32, -a, a)
    return {
        "embedding": jax.random.normal(ks[0], (vocab_size, E), jnp.float32),
        "wih_f": u(ks[1], (E, H), k_rnn),
        "whh_f": u(ks[2], (H, H), k_rnn),
        "b_f":   u(ks[3], (1, H), k_rnn),   # = b_ih + b_hh folded together
        "wih_b": u(ks[4], (E, H), k_rnn),
        "whh_b": u(ks[5], (H, H), k_rnn),
        "b_b":   u(ks[6], (1, H), k_rnn),
        "w_lin": u(ks[7], (2 * H, num_classes), k_lin),
        "b_lin": u(ks[8], (1, num_classes), k_lin),
    }


def reference(params, inputs, inputs_len):
    """Pure-JAX reference reproducing the packed bidirectional RNN semantics."""
    emb = params["embedding"][inputs].astype(jnp.float32)
    B, T, _ = emb.shape
    lens = inputs_len.astype(jnp.int32)[:, None]
    h = jnp.zeros((B, HIDDEN_DIM), jnp.float32)
    for t in range(T):
        h_new = jnp.tanh(emb[:, t, :] @ params["wih_f"]
                         + h @ params["whh_f"] + params["b_f"])
        h = jnp.where(t < lens, h_new, h)
    h_f = h
    h = jnp.zeros((B, HIDDEN_DIM), jnp.float32)
    for t in range(T - 1, -1, -1):
        h_new = jnp.tanh(emb[:, t, :] @ params["wih_b"]
                         + h @ params["whh_b"] + params["b_b"])
        h = jnp.where(t < lens, h_new, h)
    h_b = h
    out_f = jnp.where(lens == jnp.max(lens), h_f, 0.0)
    cat = jnp.concatenate([out_f, h_b], axis=1)
    return cat @ params["w_lin"] + params["b_lin"]


if __name__ == "__main__":
    vocab_size = 100
    num_classes = 3
    B, T = 4, 8

    key = jax.random.PRNGKey(0)
    k_par, k_tok = jax.random.split(key)
    params = make_params(k_par, vocab_size, num_classes)

    inputs = jax.random.randint(k_tok, (B, T), 0, vocab_size, jnp.int32)
    inputs_len = jnp.array([8, 5, 8, 3], dtype=jnp.int32)  # max == T (padded batch)

    # NOTE: nn.Dropout is defined in __init__ but never applied in forward.
    out = rnn_forward(params, inputs, inputs_len)
    out = jax.block_until_ready(out)

    ref = reference(params, inputs, inputs_len)
    np.testing.assert_allclose(np.asarray(out), np.asarray(ref),
                               rtol=1e-4, atol=1e-4)
    print("KERNEL_OK")
</pallas_src>

<mosaic_0001>
module attributes {stable_mosaic.version = 11 : i64} {
  func.func @birnn_kernel(%arg0: memref<8x1xi32, #tpu.memory_space<vmem>>, %arg1: memref<8x1xf32, #tpu.memory_space<vmem>>, %arg2: memref<64x128xf32, #tpu.memory_space<vmem>>, %arg3: memref<128x256xf32, #tpu.memory_space<vmem>>, %arg4: memref<128x128xf32, #tpu.memory_space<vmem>>, %arg5: memref<128x128xf32, #tpu.memory_space<vmem>>, %arg6: memref<1x128xf32, #tpu.memory_space<vmem>>, %arg7: memref<1x128xf32, #tpu.memory_space<vmem>>, %arg8: memref<256x128xf32, #tpu.memory_space<vmem>>, %arg9: memref<1x128xf32, #tpu.memory_space<vmem>>, %arg10: memref<8x128xf32, #tpu.memory_space<vmem>>) attributes {dimension_semantics = [], scalar_prefetch = 0 : i64, scratch_operands = 0 : i64, tpu.core_type = #tpu.core_type<tc>} {
    %c0 = arith.constant 0 : index
    %c0_0 = arith.constant 0 : index
    %0 = vector.load %arg0[%c0, %c0_0] : memref<8x1xi32, #tpu.memory_space<vmem>>, vector<8x1xi32>
    %c0_1 = arith.constant 0 : index
    %c0_2 = arith.constant 0 : index
    %1 = vector.load %arg4[%c0_1, %c0_2] : memref<128x128xf32, #tpu.memory_space<vmem>>, vector<128x128xf32>
    %c0_3 = arith.constant 0 : index
    %c0_4 = arith.constant 0 : index
    %2 = vector.load %arg5[%c0_3, %c0_4] : memref<128x128xf32, #tpu.memory_space<vmem>>, vector<128x128xf32>
    %c0_5 = arith.constant 0 : index
    %c0_6 = arith.constant 0 : index
    %3 = vector.load %arg2[%c0_5, %c0_6] : memref<64x128xf32, #tpu.memory_space<vmem>>, vector<64x128xf32>
    %c0_7 = arith.constant 0 : index
    %c0_8 = arith.constant 0 : index
    %4 = vector.load %arg3[%c0_7, %c0_8] : memref<128x256xf32, #tpu.memory_space<vmem>>, vector<128x256xf32>
    %cst = arith.constant dense<0.000000e+00> : vector<64x256xf32>
    %5 = tpu.matmul %3, %4, %cst {dimension_numbers = #tpu.dot_dimension_numbers<[1], [0], [0], [1], [0, 0, 1, 1], [], []>} : vector<64x128xf32>, vector<128x256xf32>, vector<64x256xf32> -> vector<64x256xf32>
    %c0_9 = arith.constant 0 : index
    %c0_10 = arith.constant 0 : index
    %6 = vector.load %arg6[%c0_9, %c0_10] : memref<1x128xf32, #tpu.memory_space<vmem>>, vector<1x128xf32>
    %7 = vector.shape_cast %6 : vector<1x128xf32> to vector<1x128xf32>
    %8 = vector.broadcast %7 : vector<1x128xf32> to vector<8x128xf32>
    %c0_11 = arith.constant 0 : index
    %c0_12 = arith.constant 0 : index
    %9 = vector.load %arg7[%c0_11, %c0_12] : memref<1x128xf32, #tpu.memory_space<vmem>>, vector<1x128xf32>
    %10 = vector.shape_cast %9 : vector<1x128xf32> to vector<1x128xf32>
    %11 = vector.broadcast %10 : vector<1x128xf32> to vector<8x128xf32>
    %cst_13 = arith.constant 0.000000e+00 : f32
    %12 = vector.broadcast %cst_13 : f32 to vector<8x128xf32>
    %cst_14 = arith.constant 0.000000e+00 : f32
    %13 = vector.broadcast %cst_14 : f32 to vector<8x128xf32>
    %14 = vector.extract_strided_slice %5 {offsets = [0, 0], sizes = [8, 128], strides = [1, 1]} : vector<64x256xf32> to vector<8x128xf32>
    %15 = vector.extract_strided_slice %5 {offsets = [56, 128], sizes = [8, 128], strides = [1, 1]} : vector<64x256xf32> to vector<8x128xf32>
    %cst_15 = arith.constant dense<0.000000e+00> : vector<8x128xf32>
    %16 = tpu.matmul %12, %1, %cst_15 {dimension_numbers = #tpu.dot_dimension_numbers<[1], [0], [0], [1], [0, 0, 1, 1], [], []>} : vector<8x128xf32>, vector<128x128xf32>, vector<8x128xf32> -> vector<8x128xf32>
    %17 = arith.addf %14, %16 : vector<8x128xf32>
    %18 = arith.addf %17, %8 : vector<8x128xf32>
    %19 = math.tanh %18 : vector<8x128xf32>
    %cst_16 = arith.constant dense<0.000000e+00> : vector<8x128xf32>
    %20 = tpu.matmul %13, %2, %cst_16 {dimension_numbers = #tpu.dot_dimension_numbers<[1], [0], [0], [1], [0, 0, 1, 1], [], []>} : vector<8x128xf32>, vector<128x128xf32>, vector<8x128xf32> -> vector<8x128xf32>
    %21 = arith.addf %15, %20 : vector<8x128xf32>
    %22 = arith.addf %21, %11 : vector<8x128xf32>
    %23 = math.tanh %22 : vector<8x128xf32>
    %c0_i32 = arith.constant 0 : i32
    %24 = vector.broadcast %c0_i32 : i32 to vector<8x1xi32>
    %25 = arith.cmpi sgt, %0, %24 : vector<8x1xi32>
    %26 = vector.shape_cast %25 : vector<8x1xi1> to vector<8x1xi1>
    %27 = vector.broadcast %26 : vector<8x1xi1> to vector<8x128xi1>
    %28 = arith.select %27, %19, %12 : vector<8x128xi1>, vector<8x128xf32>
    %c7_i32 = arith.constant 7 : i32
    %29 = vector.broadcast %c7_i32 : i32 to vector<8x1xi32>
    %30 = arith.cmpi sgt, %0, %29 : vector<8x1xi32>
    %31 = vector.shape_cast %30 : vector<8x1xi1> to vector<8x1xi1>
    %32 = vector.broadcast %31 : vector<8x1xi1> to vector<8x128xi1>
    %33 = arith.select %32, %23, %13 : vector<8x128xi1>, vector<8x128xf32>
    %34 = vector.extract_strided_slice %5 {offsets = [8, 0], sizes = [8, 128], strides = [1, 1]} : vector<64x256xf32> to vector<8x128xf32>
    %35 = vector.extract_strided_slice %5 {offsets = [48, 128], sizes = [8, 128], strides = [1, 1]} : vector<64x256xf32> to vector<8x128xf32>
    %cst_17 = arith.constant dense<0.000000e+00> : vector<8x128xf32>
    %36 = tpu.matmul %28, %1, %cst_17 {dimension_numbers = #tpu.dot_dimension_numbers<[1], [0], [0], [1], [0, 0, 1, 1], [], []>} : vector<8x128xf32>, vector<128x128xf32>, vector<8x128xf32> -> vector<8x128xf32>
    %37 = arith.addf %34, %36 : vector<8x128xf32>
    %38 = arith.addf %37, %8 : vector<8x128xf32>
    %39 = math.tanh %38 : vector<8x128xf32>
    %cst_18 = arith.constant dense<0.000000e+00> : vector<8x128xf32>
    %40 = tpu.matmul %33, %2, %cst_18 {dimension_numbers = #tpu.dot_dimension_numbers<[1], [0], [0], [1], [0, 0, 1, 1], [], []>} : vector<8x128xf32>, vector<128x128xf32>, vector<8x128xf32> -> vector<8x128xf32>
    %41 = arith.addf %35, %40 : vector<8x128xf32>
    %42 = arith.addf %41, %11 : vector<8x128xf32>
    %43 = math.tanh %42 : vector<8x128xf32>
    %c1_i32 = arith.constant 1 : i32
    %44 = vector.broadcast %c1_i32 : i32 to vector<8x1xi32>
    %45 = arith.cmpi sgt, %0, %44 : vector<8x1xi32>
    %46 = vector.shape_cast %45 : vector<8x1xi1> to vector<8x1xi1>
    %47 = vector.broadcast %46 : vector<8x1xi1> to vector<8x128xi1>
    %48 = arith.select %47, %39, %28 : vector<8x128xi1>, vector<8x128xf32>
    %c6_i32 = arith.constant 6 : i32
    %49 = vector.broadcast %c6_i32 : i32 to vector<8x1xi32>
    %50 = arith.cmpi sgt, %0, %49 : vector<8x1xi32>
    %51 = vector.shape_cast %50 : vector<8x1xi1> to vector<8x1xi1>
    %52 = vector.broadcast %51 : vector<8x1xi1> to vector<8x128xi1>
    %53 = arith.select %52, %43, %33 : vector<8x128xi1>, vector<8x128xf32>
    %54 = vector.extract_strided_slice %5 {offsets = [16, 0], sizes = [8, 128], strides = [1, 1]} : vector<64x256xf32> to vector<8x128xf32>
    %55 = vector.extract_strided_slice %5 {offsets = [40, 128], sizes = [8, 128], strides = [1, 1]} : vector<64x256xf32> to vector<8x128xf32>
    %cst_19 = arith.constant dense<0.000000e+00> : vector<8x128xf32>
    %56 = tpu.matmul %48, %1, %cst_19 {dimension_numbers = #tpu.dot_dimension_numbers<[1], [0], [0], [1], [0, 0, 1, 1], [], []>} : vector<8x128xf32>, vector<128x128xf32>, vector<8x128xf32> -> vector<8x128xf32>
    %57 = arith.addf %54, %56 : vector<8x128xf32>
    %58 = arith.addf %57, %8 : vector<8x128xf32>
    %59 = math.tanh %58 : vector<8x128xf32>
    %cst_20 = arith.constant dense<0.000000e+00> : vector<8x128xf32>
    %60 = tpu.matmul %53, %2, %cst_20 {dimension_numbers = #tpu.dot_dimension_numbers<[1], [0], [0], [1], [0, 0, 1, 1], [], []>} : vector<8x128xf32>, vector<128x128xf32>, vector<8x128xf32> -> vector<8x128xf32>
    %61 = arith.addf %55, %60 : vector<8x128xf32>
    %62 = arith.addf %61, %11 : vector<8x128xf32>
    %63 = math.tanh %62 : vector<8x128xf32>
    %c2_i32 = arith.constant 2 : i32
    %64 = vector.broadcast %c2_i32 : i32 to vector<8x1xi32>
    %65 = arith.cmpi sgt, %0, %64 : vector<8x1xi32>
    %66 = vector.shape_cast %65 : vector<8x1xi1> to vector<8x1xi1>
    %67 = vector.broadcast %66 : vector<8x1xi1> to vector<8x128xi1>
    %68 = arith.select %67, %59, %48 : vector<8x128xi1>, vector<8x128xf32>
    %c5_i32 = arith.constant 5 : i32
    %69 = vector.broadcast %c5_i32 : i32 to vector<8x1xi32>
    %70 = arith.cmpi sgt, %0, %69 : vector<8x1xi32>
    %71 = vector.shape_cast %70 : vector<8x1xi1> to vector<8x1xi1>
    %72 = vector.broadcast %71 : vector<8x1xi1> to vector<8x128xi1>
    %73 = arith.select %72, %63, %53 : vector<8x128xi1>, vector<8x128xf32>
    %74 = vector.extract_strided_slice %5 {offsets = [24, 0], sizes = [8, 128], strides = [1, 1]} : vector<64x256xf32> to vector<8x128xf32>
    %75 = vector.extract_strided_slice %5 {offsets = [32, 128], sizes = [8, 128], strides = [1, 1]} : vector<64x256xf32> to vector<8x128xf32>
    %cst_21 = arith.constant dense<0.000000e+00> : vector<8x128xf32>
    %76 = tpu.matmul %68, %1, %cst_21 {dimension_numbers = #tpu.dot_dimension_numbers<[1], [0], [0], [1], [0, 0, 1, 1], [], []>} : vector<8x128xf32>, vector<128x128xf32>, vector<8x128xf32> -> vector<8x128xf32>
    %77 = arith.addf %74, %76 : vector<8x128xf32>
    %78 = arith.addf %77, %8 : vector<8x128xf32>
    %79 = math.tanh %78 : vector<8x128xf32>
    %cst_22 = arith.constant dense<0.000000e+00> : vector<8x128xf32>
    %80 = tpu.matmul %73, %2, %cst_22 {dimension_numbers = #tpu.dot_dimension_numbers<[1], [0], [0], [1], [0, 0, 1, 1], [], []>} : vector<8x128xf32>, vector<128x128xf32>, vector<8x128xf32> -> vector<8x128xf32>
    %81 = arith.addf %75, %80 : vector<8x128xf32>
    %82 = arith.addf %81, %11 : vector<8x128xf32>
    %83 = math.tanh %82 : vector<8x128xf32>
    %c3_i32 = arith.constant 3 : i32
    %84 = vector.broadcast %c3_i32 : i32 to vector<8x1xi32>
    %85 = arith.cmpi sgt, %0, %84 : vector<8x1xi32>
    %86 = vector.shape_cast %85 : vector<8x1xi1> to vector<8x1xi1>
    %87 = vector.broadcast %86 : vector<8x1xi1> to vector<8x128xi1>
    %88 = arith.select %87, %79, %68 : vector<8x128xi1>, vector<8x128xf32>
    %c4_i32 = arith.constant 4 : i32
    %89 = vector.broadcast %c4_i32 : i32 to vector<8x1xi32>
    %90 = arith.cmpi sgt, %0, %89 : vector<8x1xi32>
    %91 = vector.shape_cast %90 : vector<8x1xi1> to vector<8x1xi1>
    %92 = vector.broadcast %91 : vector<8x1xi1> to vector<8x128xi1>
    %93 = arith.select %92, %83, %73 : vector<8x128xi1>, vector<8x128xf32>
    %94 = vector.extract_strided_slice %5 {offsets = [32, 0], sizes = [8, 128], strides = [1, 1]} : vector<64x256xf32> to vector<8x128xf32>
    %95 = vector.extract_strided_slice %5 {offsets = [24, 128], sizes = [8, 128], strides = [1, 1]} : vector<64x256xf32> to vector<8x128xf32>
    %cst_23 = arith.constant dense<0.000000e+00> : vector<8x128xf32>
    %96 = tpu.matmul %88, %1, %cst_23 {dimension_numbers = #tpu.dot_dimension_numbers<[1], [0], [0], [1], [0, 0, 1, 1], [], []>} : vector<8x128xf32>, vector<128x128xf32>, vector<8x128xf32> -> vector<8x128xf32>
    %97 = arith.addf %94, %96 : vector<8x128xf32>
    %98 = arith.addf %97, %8 : vector<8x128xf32>
    %99 = math.tanh %98 : vector<8x128xf32>
    %cst_24 = arith.constant dense<0.000000e+00> : vector<8x128xf32>
    %100 = tpu.matmul %93, %2, %cst_24 {dimension_numbers = #tpu.dot_dimension_numbers<[1], [0], [0], [1], [0, 0, 1, 1], [], []>} : vector<8x128xf32>, vector<128x128xf32>, vector<8x128xf32> -> vector<8x128xf32>
    %101 = arith.addf %95, %100 : vector<8x128xf32>
    %102 = arith.addf %101, %11 : vector<8x128xf32>
    %103 = math.tanh %102 : vector<8x128xf32>
    %c4_i32_25 = arith.constant 4 : i32
    %104 = vector.broadcast %c4_i32_25 : i32 to vector<8x1xi32>
    %105 = arith.cmpi sgt, %0, %104 : vector<8x1xi32>
    %106 = vector.shape_cast %105 : vector<8x1xi1> to vector<8x1xi1>
    %107 = vector.broadcast %106 : vector<8x1xi1> to vector<8x128xi1>
    %108 = arith.select %107, %99, %88 : vector<8x128xi1>, vector<8x128xf32>
    %c3_i32_26 = arith.constant 3 : i32
    %109 = vector.broadcast %c3_i32_26 : i32 to vector<8x1xi32>
    %110 = arith.cmpi sgt, %0, %109 : vector<8x1xi32>
    %111 = vector.shape_cast %110 : vector<8x1xi1> to vector<8x1xi1>
    %112 = vector.broadcast %111 : vector<8x1xi1> to vector<8x128xi1>
    %113 = arith.select %112, %103, %93 : vector<8x128xi1>, vector<8x128xf32>
    %114 = vector.extract_strided_slice %5 {offsets = [40, 0], sizes = [8, 128], strides = [1, 1]} : vector<64x256xf32> to vector<8x128xf32>
    %115 = vector.extract_strided_slice %5 {offsets = [16, 128], sizes = [8, 128], strides = [1, 1]} : vector<64x256xf32> to vector<8x128xf32>
    %cst_27 = arith.constant dense<0.000000e+00> : vector<8x128xf32>
    %116 = tpu.matmul %108, %1, %cst_27 {dimension_numbers = #tpu.dot_dimension_numbers<[1], [0], [0], [1], [0, 0, 1, 1], [], []>} : vector<8x128xf32>, vector<128x128xf32>, vector<8x128xf32> -> vector<8x128xf32>
    %117 = arith.addf %114, %116 : vector<8x128xf32>
    %118 = arith.addf %117, %8 : vector<8x128xf32>
    %119 = math.tanh %118 : vector<8x128xf32>
    %cst_28 = arith.constant dense<0.000000e+00> : vector<8x128xf32>
    %120 = tpu.matmul %113, %2, %cst_28 {dimension_numbers = #tpu.dot_dimension_numbers<[1], [0], [0], [1], [0, 0, 1, 1], [], []>} : vector<8x128xf32>, vector<128x128xf32>, vector<8x128xf32> -> vector<8x128xf32>
    %121 = arith.addf %115, %120 : vector<8x128xf32>
    %122 = arith.addf %121, %11 : vector<8x128xf32>
    %123 = math.tanh %122 : vector<8x128xf32>
    %c5_i32_29 = arith.constant 5 : i32
    %124 = vector.broadcast %c5_i32_29 : i32 to vector<8x1xi32>
    %125 = arith.cmpi sgt, %0, %124 : vector<8x1xi32>
    %126 = vector.shape_cast %125 : vector<8x1xi1> to vector<8x1xi1>
    %127 = vector.broadcast %126 : vector<8x1xi1> to vector<8x128xi1>
    %128 = arith.select %127, %119, %108 : vector<8x128xi1>, vector<8x128xf32>
    %c2_i32_30 = arith.constant 2 : i32
    %129 = vector.broadcast %c2_i32_30 : i32 to vector<8x1xi32>
    %130 = arith.cmpi sgt, %0, %129 : vector<8x1xi32>
    %131 = vector.shape_cast %130 : vector<8x1xi1> to vector<8x1xi1>
    %132 = vector.broadcast %131 : vector<8x1xi1> to vector<8x128xi1>
    %133 = arith.select %132, %123, %113 : vector<8x128xi1>, vector<8x128xf32>
    %134 = vector.extract_strided_slice %5 {offsets = [48, 0], sizes = [8, 128], strides = [1, 1]} : vector<64x256xf32> to vector<8x128xf32>
    %135 = vector.extract_strided_slice %5 {offsets = [8, 128], sizes = [8, 128], strides = [1, 1]} : vector<64x256xf32> to vector<8x128xf32>
    %cst_31 = arith.constant dense<0.000000e+00> : vector<8x128xf32>
    %136 = tpu.matmul %128, %1, %cst_31 {dimension_numbers = #tpu.dot_dimension_numbers<[1], [0], [0], [1], [0, 0, 1, 1], [], []>} : vector<8x128xf32>, vector<128x128xf32>, vector<8x128xf32> -> vector<8x128xf32>
    %137 = arith.addf %134, %136 : vector<8x128xf32>
    %138 = arith.addf %137, %8 : vector<8x128xf32>
    %139 = math.tanh %138 : vector<8x128xf32>
    %cst_32 = arith.constant dense<0.000000e+00> : vector<8x128xf32>
    %140 = tpu.matmul %133, %2, %cst_32 {dimension_numbers = #tpu.dot_dimension_numbers<[1], [0], [0], [1], [0, 0, 1, 1], [], []>} : vector<8x128xf32>, vector<128x128xf32>, vector<8x128xf32> -> vector<8x128xf32>
    %141 = arith.addf %135, %140 : vector<8x128xf32>
    %142 = arith.addf %141, %11 : vector<8x128xf32>
    %143 = math.tanh %142 : vector<8x128xf32>
    %c6_i32_33 = arith.constant 6 : i32
    %144 = vector.broadcast %c6_i32_33 : i32 to vector<8x1xi32>
    %145 = arith.cmpi sgt, %0, %144 : vector<8x1xi32>
    %146 = vector.shape_cast %145 : vector<8x1xi1> to vector<8x1xi1>
    %147 = vector.broadcast %146 : vector<8x1xi1> to vector<8x128xi1>
    %148 = arith.select %147, %139, %128 : vector<8x128xi1>, vector<8x128xf32>
    %c1_i32_34 = arith.constant 1 : i32
    %149 = vector.broadcast %c1_i32_34 : i32 to vector<8x1xi32>
    %150 = arith.cmpi sgt, %0, %149 : vector<8x1xi32>
    %151 = vector.shape_cast %150 : vector<8x1xi1> to vector<8x1xi1>
    %152 = vector.broadcast %151 : vector<8x1xi1> to vector<8x128xi1>
    %153 = arith.select %152, %143, %133 : vector<8x128xi1>, vector<8x128xf32>
    %154 = vector.extract_strided_slice %5 {offsets = [56, 0], sizes = [8, 128], strides = [1, 1]} : vector<64x256xf32> to vector<8x128xf32>
    %155 = vector.extract_strided_slice %5 {offsets = [0, 128], sizes = [8, 128], strides = [1, 1]} : vector<64x256xf32> to vector<8x128xf32>
    %cst_35 = arith.constant dense<0.000000e+00> : vector<8x128xf32>
    %156 = tpu.matmul %148, %1, %cst_35 {dimension_numbers = #tpu.dot_dimension_numbers<[1], [0], [0], [1], [0, 0, 1, 1], [], []>} : vector<8x128xf32>, vector<128x128xf32>, vector<8x128xf32> -> vector<8x128xf32>
    %157 = arith.addf %154, %156 : vector<8x128xf32>
    %158 = arith.addf %157, %8 : vector<8x128xf32>
    %159 = math.tanh %158 : vector<8x128xf32>
    %cst_36 = arith.constant dense<0.000000e+00> : vector<8x128xf32>
    %160 = tpu.matmul %153, %2, %cst_36 {dimension_numbers = #tpu.dot_dimension_numbers<[1], [0], [0], [1], [0, 0, 1, 1], [], []>} : vector<8x128xf32>, vector<128x128xf32>, vector<8x128xf32> -> vector<8x128xf32>
    %161 = arith.addf %155, %160 : vector<8x128xf32>
    %162 = arith.addf %161, %11 : vector<8x128xf32>
    %163 = math.tanh %162 : vector<8x128xf32>
    %c7_i32_37 = arith.constant 7 : i32
    %164 = vector.broadcast %c7_i32_37 : i32 to vector<8x1xi32>
    %165 = arith.cmpi sgt, %0, %164 : vector<8x1xi32>
    %166 = vector.shape_cast %165 : vector<8x1xi1> to vector<8x1xi1>
    %167 = vector.broadcast %166 : vector<8x1xi1> to vector<8x128xi1>
    %168 = arith.select %167, %159, %148 : vector<8x128xi1>, vector<8x128xf32>
    %c0_i32_38 = arith.constant 0 : i32
    %169 = vector.broadcast %c0_i32_38 : i32 to vector<8x1xi32>
    %170 = arith.cmpi sgt, %0, %169 : vector<8x1xi32>
    %171 = vector.shape_cast %170 : vector<8x1xi1> to vector<8x1xi1>
    %172 = vector.broadcast %171 : vector<8x1xi1> to vector<8x128xi1>
    %173 = arith.select %172, %163, %153 : vector<8x128xi1>, vector<8x128xf32>
    %c0_39 = arith.constant 0 : index
    %c0_40 = arith.constant 0 : index
    %174 = vector.load %arg1[%c0_39, %c0_40] : memref<8x1xf32, #tpu.memory_space<vmem>>, vector<8x1xf32>
    %175 = vector.broadcast %174 : vector<8x1xf32> to vector<8x128xf32>
    %176 = arith.mulf %168, %175 : vector<8x128xf32>
    %c0_41 = arith.constant 0 : index
    %c0_42 = arith.constant 0 : index
    %177 = vector.load %arg8[%c0_41, %c0_42] : memref<256x128xf32, #tpu.memory_space<vmem>>, vector<256x128xf32>
    %178 = vector.extract_strided_slice %177 {offsets = [0, 0], sizes = [128, 128], strides = [1, 1]} : vector<256x128xf32> to vector<128x128xf32>
    %cst_43 = arith.constant dense<0.000000e+00> : vector<8x128xf32>
    %179 = tpu.matmul %176, %178, %cst_43 {dimension_numbers = #tpu.dot_dimension_numbers<[1], [0], [0], [1], [0, 0, 1, 1], [], []>} : vector<8x128xf32>, vector<128x128xf32>, vector<8x128xf32> -> vector<8x128xf32>
    %180 = vector.extract_strided_slice %177 {offsets = [128, 0], sizes = [128, 128], strides = [1, 1]} : vector<256x128xf32> to vector<128x128xf32>
    %cst_44 = arith.constant dense<0.000000e+00> : vector<8x128xf32>
    %181 = tpu.matmul %173, %180, %cst_44 {dimension_numbers = #tpu.dot_dimension_numbers<[1], [0], [0], [1], [0, 0, 1, 1], [], []>} : vector<8x128xf32>, vector<128x128xf32>, vector<8x128xf32> -> vector<8x128xf32>
    %182 = arith.addf %179, %181 : vector<8x128xf32>
    %c0_45 = arith.constant 0 : index
    %c0_46 = arith.constant 0 : index
    %183 = vector.load %arg9[%c0_45, %c0_46] : memref<1x128xf32, #tpu.memory_space<vmem>>, vector<1x128xf32>
    %184 = vector.broadcast %183 : vector<1x128xf32> to vector<8x128xf32>
    %185 = arith.addf %182, %184 : vector<8x128xf32>
    %c0_47 = arith.constant 0 : index
    %c0_48 = arith.constant 0 : index
    %186 = vector.load %arg10[%c0_47, %c0_48] : memref<8x128xf32, #tpu.memory_space<vmem>>, vector<8x128xf32>
    tpu.vector_store %arg10[%c0_47, %c0_48], %185 {strides = array<i32>} : memref<8x128xf32, #tpu.memory_space<vmem>>, vector<8x128xf32>,
    return
  }
}

</mosaic_0001>

<bundles_post_ra>
// kernel: tpu_custom_call.1
= control target key start
LH: loop header
LB: loop body
LE: loop exit
PB: predicated region body
PF: predicated region fallthrough
CT: control target
= control target key end

     0   :  { %15 = vsyncpa [#allocation3], 0  ;;  %s3997_s0 = inlined_call_operand.vmem [shape: s32[8,1], index: 0, kind: input, shape index: {}]   ;;  %s3998_s1 = inlined_call_operand.vmem [shape: f32[8,1], index: 1, kind: input, shape index: {}]   ;;  %s3999_s2 = inlined_call_operand.hbm [shape: f32[64,128], index: 2, kind: input, shape index: {}]   ;;  %s4000_s3 = inlined_call_operand.hbm [shape: f32[128,256], index: 3, kind: input, shape index: {}]   ;;  %s4001_s4 = inlined_call_operand.hbm [shape: f32[128,128], index: 4, kind: input, shape index: {}]   ;;  %s4002_s5 = inlined_call_operand.hbm [shape: f32[128,128], index: 5, kind: input, shape index: {}]   ;;  %s4003_s6 = inlined_call_operand.vmem [shape: f32[1,128], index: 6, kind: input, shape index: {}]   ;;  %s4004_s7 = inlined_call_operand.vmem [shape: f32[1,128], index: 7, kind: input, shape index: {}]   ;;  %s4005_s8 = inlined_call_operand.hbm [shape: f32[256,128], index: 8, kind: input, shape index: {}]   ;;  %s4006_s9 = inlined_call_operand.vmem [shape: f32[1,128], index: 9, kind: input, shape index: {}]   ;;  %s4007_s10 = inlined_call_operand.hbm [shape: f32[8,128], index: 10, kind: output, shape index: {}]  }
   0x1   :  { %16 = vsyncpa [#allocation6], 0 }
   0x2   :  { %17 = vsyncpa [#allocation9], 0 }
   0x3   :  { %18 = vsyncpa [#allocation4], 0  ;;  %s3334_s13 = smov [#allocation5]   ;;  %s3194_s17 = scalar_lea.hbm %s4000_s3, 4096 }
   0x4   :  { %s40_s14 = sshll.u32 %s3334_s13, 4  ;;  %p3195_p0 = scmp.ne.s32.totalorder %s4000_s3, %s3194_s17  ;;  %s41_s14 = int_to_ptr.vmem [resolvable:$true] %s40_s14 }
   0x5   :  { %p3198_p1 = scmp.lt.u32.totalorder %s3194_s17, %s4000_s3 }
   0x7   :  { %p3200_p2 = pnand %p3198_p1, %p3195_p0 }
   0x9   :  { %3203 = shalt.err (!%p3200_p2)
}
   0xa   :  { %s3204_s22 = scalar_lea.vmem %s41_s14, 4096  ;;  %p3209_p4 = scmp.lt.s32.totalorder %s41_s14, %s41_s14 }
   0xb   :  { %p3205_p3 = scmp.ne.s32.totalorder %s41_s14, %s3204_s22  ;;  %p3210_p5 = scmp.lt.s32.totalorder %s3204_s22, %s3204_s22 }
   0xd   :  { %p3211_p6 = por %p3210_p5, %p3209_p4 }
   0xf   :  { %p3212_p7 = pnand %p3211_p6, %p3205_p3 }
  0x11   :  { %3215 = shalt.err (!%p3212_p7)
}
  0x12   :  { %s3335_s23 = smov 256   ;;  %s3336_s24 = smov 16  }
  0x13   :  { %46 = dma.hbm_to_vmem [thread:$0]  %s4000_s3, 4096, %s41_s14, [#allocation6], %s3335_s23, %s3335_s23, %s3336_s24  }
  0x14   :  { %s3337_s27 = smov [#allocation8]   ;;  %s3338_s29 = smov [#allocation2]  }
  0x15   :  { %s64_s28 = sshll.u32 %s3337_s27, 4  ;;  %s28_s30 = sshll.u32 %s3338_s29, 4  ;;  %s65_s28 = int_to_ptr.vmem [resolvable:$true] %s64_s28  ;;  %s29_s30 = int_to_ptr.vmem [resolvable:$true] %s28_s30 }
  0x16   :  { %s3216_s13 = scalar_lea.hbm %s4002_s5, 2048 }
  0x17   :  { %p3217_p8 = scmp.ne.s32.totalorder %s4002_s5, %s3216_s13  ;;  %p3220_p9 = scmp.lt.u32.totalorder %s3216_s13, %s4002_s5 }
  0x19   :  { %p3222_p10 = pnand %p3220_p9, %p3217_p8 }
  0x1b   :  { %3225 = shalt.err (!%p3222_p10)
}
  0x1c   :  { %s3226_s3 = scalar_lea.vmem %s65_s28, 2048  ;;  %p3231_p12 = scmp.lt.s32.totalorder %s65_s28, %s65_s28 }
  0x1d   :  { %p3227_p11 = scmp.ne.s32.totalorder %s65_s28, %s3226_s3  ;;  %p3232_p13 = scmp.lt.s32.totalorder %s3226_s3, %s3226_s3 }
  0x1f   :  { %p3233_p0 = por %p3232_p13, %p3231_p12 }
  0x21   :  { %p3234_p1 = pnand %p3233_p0, %p3227_p11 }
  0x23   :  { %3237 = shalt.err (!%p3234_p1)
}
  0x24   :  { %s3339_s14 = smov 128   ;;  %s3340_s19 = smov 8  }
  0x25   :  { %70 = dma.hbm_to_vmem [thread:$0]  %s4002_s5, 2048, %s65_s28, [#allocation9], %s3339_s14, %s3339_s14, %s3340_s19  }
  0x26   :  { %s3238_s24 = scalar_lea.hbm %s3999_s2, 1024 }
  0x27   :  { %p3239_p2 = scmp.ne.s32.totalorder %s3999_s2, %s3238_s24  ;;  %p3242_p3 = scmp.lt.u32.totalorder %s3238_s24, %s3999_s2 }
  0x29   :  { %p3244_p4 = pnand %p3242_p3, %p3239_p2 }
  0x2b   :  { %3247 = shalt.err (!%p3244_p4)
}
  0x2c   :  { %s3248_s11 = scalar_lea.vmem %s29_s30, 1024  ;;  %p3253_p6 = scmp.lt.s32.totalorder %s29_s30, %s29_s30 }
  0x2d   :  { %p3249_p5 = scmp.ne.s32.totalorder %s29_s30, %s3248_s11  ;;  %p3254_p7 = scmp.lt.s32.totalorder %s3248_s11, %s3248_s11 }
  0x2f   :  { %p3255_p8 = por %p3254_p7, %p3253_p6 }
  0x31   :  { %p3256_p9 = pnand %p3255_p8, %p3249_p5 }
  0x33   :  { %3259 = shalt.err (!%p3256_p9)
}
  0x34   :  { %34 = dma.hbm_to_vmem [thread:$0]  %s3999_s2, 1024, %s29_s30, [#allocation3], %s3339_s14, %s3339_s14, %s3340_s19  }
  0x35   :  { %s3341_s12 = smov [#allocation7]   ;;  %s3342_s15 = smov [#allocation10]  }
  0x36   :  { %s52_s13 = sshll.u32 %s3341_s12, 4  ;;  %s80_s16 = sshll.u32 %s3342_s15, 4  ;;  %s53_s13 = int_to_ptr.vmem [resolvable:$true] %s52_s13  ;;  %s81_s16 = int_to_ptr.vmem [resolvable:$true] %s80_s16 }
  0x37   :  { %s3260_s3 = scalar_lea.hbm %s4001_s4, 2048 }
  0x38   :  { %p3261_p10 = scmp.ne.s32.totalorder %s4001_s4, %s3260_s3  ;;  %p3264_p11 = scmp.lt.u32.totalorder %s3260_s3, %s4001_s4 }
  0x3a   :  { %p3266_p12 = pnand %p3264_p11, %p3261_p10 }
  0x3c   :  { %3269 = shalt.err (!%p3266_p12)
}
  0x3d   :  { %s3270_s2 = scalar_lea.vmem %s53_s13, 2048  ;;  %p3275_p0 = scmp.lt.s32.totalorder %s53_s13, %s53_s13 }
  0x3e   :  { %p3271_p13 = scmp.ne.s32.totalorder %s53_s13, %s3270_s2  ;;  %p3276_p1 = scmp.lt.s32.totalorder %s3270_s2, %s3270_s2 }
  0x40   :  { %p3277_p2 = por %p3276_p1, %p3275_p0 }
  0x42   :  { %p3278_p3 = pnand %p3277_p2, %p3271_p13 }
  0x44   :  { %3281 = shalt.err (!%p3278_p3)
}
  0x45   :  { %58 = dma.hbm_to_vmem [thread:$0]  %s4001_s4, 2048, %s53_s13, [#allocation6], %s3339_s14, %s3339_s14, %s3340_s19  }
  0x46   :  { %s3282_s27 = scalar_lea.hbm %s4005_s8, 4096 }
  0x47   :  { %p3283_p4 = scmp.ne.s32.totalorder %s4005_s8, %s3282_s27  ;;  %p3286_p5 = scmp.lt.u32.totalorder %s3282_s27, %s4005_s8 }
  0x49   :  { %p3288_p6 = pnand %p3286_p5, %p3283_p4 }
  0x4b   :  { %3291 = shalt.err (!%p3288_p6)
}
  0x4c   :  { %s3292_s12 = scalar_lea.vmem %s81_s16, 4096  ;;  %p3297_p8 = scmp.lt.s32.totalorder %s81_s16, %s81_s16 }
  0x4d   :  { %p3293_p7 = scmp.ne.s32.totalorder %s81_s16, %s3292_s12  ;;  %p3298_p9 = scmp.lt.s32.totalorder %s3292_s12, %s3292_s12 }
  0x4f   :  { %p3299_p10 = por %p3298_p9, %p3297_p8 }
  0x51   :  { %p3300_p11 = pnand %p3299_p10, %p3293_p7 }
  0x53   :  { %3303 = shalt.err (!%p3300_p11)
}
  0x54   :  { %86 = dma.hbm_to_vmem [thread:$0]  %s4005_s8, 4096, %s81_s16, [#allocation9], %s3339_s14, %s3339_s14, %s3340_s19  }
  0x55   :  { %3326 = dma.done.wait [#allocation3], 1024  }
  0x56   :  { %3327 = vsyncadd [#allocation3], 4294966272 }
  0x57   :  { %3328 = dma.done.wait [#allocation6], 6144  }
  0x58   :  { %3329 = vsyncadd [#allocation6], 4294961152 }
  0x59   :  { %3330 = dma.done.wait [#allocation9], 6144  }
  0x5a   :  { %3331 = vsyncadd [#allocation9], 4294961152  ;;  %v3343_v0 = vmov 0.0|0.0   ;;  %v3344_v1 = vmov 0.0   ;;  %vm3345_vm0 = vmmov 0   ;;  %v3346_v2 = vmov 0  }
  0x5b   :  { %2714 = vmatprep.subr.bf16.mxu1 %v3343_v0  ;;  %241 = vmatprep.mubr.f32.mxu0 %v3344_v1  ;;  %v146_v3 = vld [vmem:[#allocation5 + $0x8] sm:$0xff]  ;;  %v148_v4 = vld [vmem:[#allocation5 + $0x18] sm:$0xff]  ;;  %v145_v5 = vld [vmem:[#allocation5] sm:$0xff]  ;;  %s3347_s18 = smov [#allocation11]  }
  0x5c   :  { %2084 = vmatprep.mubr.msk.f32.mxu1 %vm3345_vm0, %v3344_v1  ;;  %3160 = vset.pattern.permute.xlu0 %v3346_v2  ;;  %v2682_v6 = vpack.c.bf16 %v148_v4, %v146_v3  ;;  %v147_v7 = vld [vmem:[#allocation5 + $0x10] sm:$0xff]  ;;  %v105_v8 = vld [vmem:[#allocation7] sm:$0xff]  ;;  %v106_v9 = vld [vmem:[#allocation7 + $0x8] sm:$0xff]  ;;  %s1730_s3 = sshll.u32 %s3347_s18, 4  ;;  %s1731_s3 = int_to_ptr.vmem [resolvable:$true] %s1730_s3 }
  0x5d   :  { %3161 = vset.pattern.permute.xlu1 %v3346_v2  ;;  %v2684_v10 = vpack.c.bf16 %v147_v7, %v145_v5  ;;  %v3481_v11 = vpack.c.bf16 %v106_v9, %v105_v8  ;;  %v150_v12 = vld [vmem:[#allocation5 + $0x28] sm:$0xff]  ;;  %v152_v13 = vld [vmem:[#allocation5 + $0x38] sm:$0xff]  ;;  %v149_v14 = vld [vmem:[#allocation5 + $0x20] sm:$0xff]  ;;  %s3304_s20 = scalar_lea.vmem %s1731_s3, 128  ;;  %p3309_p13 = scmp.lt.s32.totalorder %s1731_s3, %s1731_s3 }
  0x5e   :  { %2683 = vmatprep.subr.bf16.mxu0 %v2682_v6  ;;  %v2686_v15 = vpack.c.bf16 %v152_v13, %v150_v12  ;;  %v151_v16 = vld [vmem:[#allocation5 + $0x30] sm:$0xff]  ;;  %v108_v18 = vld [vmem:[#allocation7 + $0x18] sm:$0xff]  ;;  %v154_v21 = vld [vmem:[#allocation5 + $0x48] sm:$0xff]  ;;  %p3305_p12 = scmp.ne.s32.totalorder %s1731_s3, %s3304_s20  ;;  %p3310_p0 = scmp.lt.s32.totalorder %s3304_s20, %s3304_s20 }
  0x5f   :  { %v107_v17 = vld [vmem:[#allocation7 + $0x10] sm:$0xff]  ;;  %2685 = vmatpush1.bf16.msra.mxu0 %v2684_v10  ;;  %2716 = vmatpush3.bf16.msra.mxu1 %v3481_v11  ;;  %v2688_v19 = vpack.c.bf16 %v151_v16, %v149_v14  ;;  %v156_v22 = vld [vmem:[#allocation5 + $0x58] sm:$0xff]  ;;  %v153_v23 = vld [vmem:[#allocation5 + $0x40] sm:$0xff] }
  0x60   :  { %v3484_v20 = vpack.c.bf16 %v108_v18, %v107_v17  ;;  %2687 = vmatprep.subr.bf16.mxu0 %v2686_v15  ;;  %2717 = vmatprep.subr.bf16.mxu1 %v3343_v0  ;;  %v2690_v24 = vpack.c.bf16 %v156_v22, %v154_v21  ;;  %v155_v25 = vld [vmem:[#allocation5 + $0x50] sm:$0xff]  ;;  %v109_v26 = vld [vmem:[#allocation7 + $0x20] sm:$0xff]  ;;  %v110_v27 = vld [vmem:[#allocation7 + $0x28] sm:$0xff]  ;;  %p3311_p1 = por %p3310_p0, %p3309_p13 }
  0x61   :  { %v158_v28 = vld [vmem:[#allocation5 + $0x68] sm:$0xff]  ;;  %v160_v29 = vld [vmem:[#allocation5 + $0x78] sm:$0xff]  ;;  %v2692_v30 = vpack.c.bf16 %v155_v25, %v153_v23  ;;  %v3488_v31 = vpack.c.bf16 %v110_v27, %v109_v26  ;;  %v157_v32 = vld [vmem:[#allocation5 + $0x60] sm:$0xff] }
  0x62   :  { %v2694_v33 = vpack.c.bf16 %v160_v29, %v158_v28  ;;  %v159_v34 = vld [vmem:[#allocation5 + $0x70] sm:$0xff]  ;;  %v112_v36 = vld [vmem:[#allocation7 + $0x38] sm:$0xff]  ;;  %v162_v37 = vld [vmem:[#allocation5 + $0x88] sm:$0xff]  ;;  %p3312_p2 = pnand %p3311_p1, %p3305_p12 }
  0x63   :  { %2689 = vmatpush1.bf16.msra.mxu0 %v2688_v19  ;;  %2719 = vmatpush3.bf16.msra.mxu1 %v3484_v20  ;;  %v111_v35 = vld [vmem:[#allocation7 + $0x30] sm:$0xff]  ;;  %v164_v38 = vld [vmem:[#allocation5 + $0x98] sm:$0xff]  ;;  %v2696_v39 = vpack.c.bf16 %v159_v34, %v157_v32  ;;  %v161_v41 = vld [vmem:[#allocation5 + $0x80] sm:$0xff] }
  0x64   :  { %2691 = vmatprep.subr.bf16.mxu0 %v2690_v24  ;;  %2720 = vmatprep.subr.bf16.mxu1 %v3343_v0  ;;  %v3492_v40 = vpack.c.bf16 %v112_v36, %v111_v35  ;;  %v2698_v42 = vpack.c.bf16 %v164_v38, %v162_v37  ;;  %v163_v43 = vld [vmem:[#allocation5 + $0x90] sm:$0xff]  ;;  %v113_v44 = vld [vmem:[#allocation7 + $0x40] sm:$0xff]  ;;  %v114_v45 = vld [vmem:[#allocation7 + $0x48] sm:$0xff] }
  0x65   :  { %v166_v46 = vld [vmem:[#allocation5 + $0xa8] sm:$0xff]  ;;  %v168_v47 = vld [vmem:[#allocation5 + $0xb8] sm:$0xff]  ;;  %v2700_v48 = vpack.c.bf16 %v163_v43, %v161_v41  ;;  %v3496_v49 = vpack.c.bf16 %v114_v45, %v113_v44  ;;  %v165_v50 = vld [vmem:[#allocation5 + $0xa0] sm:$0xff] }
  0x66   :  { %v2702_v51 = vpack.c.bf16 %v168_v47, %v166_v46  ;;  %v167_v52 = vld [vmem:[#allocation5 + $0xb0] sm:$0xff]  ;;  %v116_v54 = vld [vmem:[#allocation7 + $0x58] sm:$0xff]  ;;  %v170_v55 = vld [vmem:[#allocation5 + $0xc8] sm:$0xff] }
  0x67   :  { %2693 = vmatpush1.bf16.msra.mxu0 %v2692_v30  ;;  %2722 = vmatpush3.bf16.msra.mxu1 %v3488_v31  ;;  %v115_v53 = vld [vmem:[#allocation7 + $0x50] sm:$0xff]  ;;  %v172_v56 = vld [vmem:[#allocation5 + $0xd8] sm:$0xff]  ;;  %v2704_v57 = vpack.c.bf16 %v167_v52, %v165_v50  ;;  %v169_v59 = vld [vmem:[#allocation5 + $0xc0] sm:$0xff] }
  0x68   :  { %2695 = vmatprep.subr.bf16.mxu0 %v2694_v33  ;;  %2723 = vmatprep.subr.bf16.mxu1 %v3343_v0  ;;  %v3500_v58 = vpack.c.bf16 %v116_v54, %v115_v53  ;;  %v2706_v60 = vpack.c.bf16 %v172_v56, %v170_v55  ;;  %v171_v61 = vld [vmem:[#allocation5 + $0xd0] sm:$0xff]  ;;  %v117_v62 = vld [vmem:[#allocation7 + $0x60] sm:$0xff]  ;;  %v118_v63 = vld [vmem:[#allocation7 + $0x68] sm:$0xff] }
  0x69   :  { %v174_v3 = vld [vmem:[#allocation5 + $0xe8] sm:$0xff]  ;;  %v176_v4 = vld [vmem:[#allocation5 + $0xf8] sm:$0xff]  ;;  %v2708_v5 = vpack.c.bf16 %v171_v61, %v169_v59  ;;  %v3504_v6 = vpack.c.bf16 %v118_v63, %v117_v62  ;;  %v173_v7 = vld [vmem:[#allocation5 + $0xe0] sm:$0xff] }
  0x6a   :  { %v3509_v8 = vld [vmem:[%s3997_s0] sm:$0xff]  ;;  %v2710_v9 = vpack.c.bf16 %v176_v4, %v174_v3  ;;  %v175_v10 = vld [vmem:[#allocation5 + $0xf0] sm:$0xff]  ;;  %v120_v13 = vld [vmem:[#allocation7 + $0x78] sm:$0xff] }
  0x6b   :  { %2697 = vmatpush1.bf16.msra.mxu0 %v2696_v39  ;;  %2725 = vmatpush3.bf16.msra.mxu1 %v3492_v40  ;;  %v119_v12 = vld [vmem:[#allocation7 + $0x70] sm:$0xff]  ;;  %vm450_vm1 = vcmp.gt.s32.totalorder %v3509_v8, 0  ;;  %vm457_vm2 = vcmp.gt.s32.totalorder %v3509_v8, 7  ;;  %v2712_v15 = vpack.c.bf16 %v175_v10, %v173_v7  ;;  %v121_v18 = vld [vmem:[#allocation8] sm:$0xff]  ;;  %v122_v19 = vld [vmem:[#allocation8 + $0x8] sm:$0xff]  ;;  %vm770_vm3 = vcmp.gt.s32.totalorder %v3509_v8, 2 }
  0x6c   :  { %2699 = vmatprep.subr.bf16.mxu0 %v2698_v42  ;;  %2726 = vmatprep.subr.bf16.mxu1 %v3343_v0  ;;  %v451_v14 = vsel %vm450_vm1, 1, %v3346_v2  ;;  %v3516_v16 = vpack.c.bf16 %v120_v13, %v119_v12  ;;  %v458_v17 = vsel %vm457_vm2, 1, %v3346_v2  ;;  %v137_v21 = vld [vmem:[#allocation2] sm:$0xff]  ;;  %v3522_v22 = vpack.c.bf16 %v122_v19, %v121_v18  ;;  %v123_v23 = vld [vmem:[#allocation8 + $0x10] sm:$0xff]  ;;  %v124_v24 = vld [vmem:[#allocation8 + $0x18] sm:$0xff] }
  0x6d   :  { %453 = vperm.xlu0 %3160, %v451_v14   ;;  %v771_v25 = vsel %vm770_vm3, 1, %v3346_v2  ;;  %vm930_vm4 = vcmp.gt.s32.totalorder %v3509_v8, 3  ;;  %v138_v26 = vld [vmem:[#allocation2 + $0x8] sm:$0xff]  ;;  %v3531_v27 = vpack.c.bf16 %v124_v24, %v123_v23  ;;  %v125_v28 = vld [vmem:[#allocation8 + $0x20] sm:$0xff]  ;;  %v139_v32 = vld [vmem:[#allocation2 + $0x10] sm:$0xff]  ;;  %vm610_vm5 = vcmp.gt.s32.totalorder %v3509_v8, 1 }
  0x6e   :  { %v126_v29 = vld [vmem:[#allocation8 + $0x28] sm:$0xff]  ;;  %v931_v30 = vsel %vm930_vm4, 1, %v3346_v2  ;;  %v127_v34 = vld [vmem:[#allocation8 + $0x30] sm:$0xff]  ;;  %v128_v35 = vld [vmem:[#allocation8 + $0x38] sm:$0xff]  ;;  %vm617_vm6 = vcmp.gt.s32.totalorder %v3509_v8, 6  ;;  %vm777_vm7 = vcmp.gt.s32.totalorder %v3509_v8, 5 }
  0x6f   :  { %2701 = vmatpush1.bf16.msra.mxu0 %v2700_v48  ;;  %2728 = vmatpush3.bf16.msra.mxu1 %v3496_v49  ;;  %v3541_v33 = vpack.c.bf16 %v126_v29, %v125_v28  ;;  %v1536_v36 = vld [vmem:[%s3998_s1] sm:$0xff]  ;;  %v140_v37 = vld [vmem:[#allocation2 + $0x18] sm:$0xff]  ;;  %v3551_v38 = vpack.c.bf16 %v128_v35, %v127_v34  ;;  %v130_v41 = vld [vmem:[#allocation8 + $0x48] sm:$0xff]  ;;  %v618_v59 = vsel %vm617_vm6, 1, %v3346_v2  ;;  %vm937_vm8 = vcmp.gt.s32.totalorder %v3509_v8, 4 }
  0x70   :  { %2703 = vmatprep.subr.bf16.mxu0 %v2702_v51  ;;  %2729 = vmatprep.subr.bf16.mxu1 %v3343_v0  ;;  %v129_v39 = vld [vmem:[#allocation8 + $0x40] sm:$0xff]  ;;  %v131_v44 = vld [vmem:[#allocation8 + $0x50] sm:$0xff]  ;;  %v132_v45 = vld [vmem:[#allocation8 + $0x58] sm:$0xff]  ;;  %v938_v61 = vsel %vm937_vm8, 1, %v3346_v2 }
  0x71   :  { %460 = vperm.xlu0 %3160, %v458_v17   ;;  %v141_v42 = vld [vmem:[#allocation2 + $0x20] sm:$0xff]  ;;  %v3558_v43 = vpack.c.bf16 %v130_v41, %v129_v39  ;;  %v142_v46 = vld [vmem:[#allocation2 + $0x28] sm:$0xff]  ;;  %v3565_v47 = vpack.c.bf16 %v132_v45, %v131_v44  ;;  %v143_v51 = vld [vmem:[#allocation2 + $0x30] sm:$0xff] }
  0x72   :  { %v133_v48 = vld [vmem:[#allocation8 + $0x60] sm:$0xff]  ;;  %v134_v50 = vld [vmem:[#allocation8 + $0x68] sm:$0xff]  ;;  %v135_v53 = vld [vmem:[#allocation8 + $0x70] sm:$0xff] }
  0x73   :  { %2705 = vmatpush1.bf16.msra.mxu0 %v2704_v57  ;;  %2731 = vmatpush3.bf16.msra.mxu1 %v3500_v58  ;;  %v3572_v52 = vpack.c.bf16 %v134_v50, %v133_v48  ;;  %v136_v54 = vld [vmem:[#allocation8 + $0x78] sm:$0xff]  ;;  %v611_v57 = vsel %vm610_vm5, 1, %v3346_v2  ;;  %v3620_v63 = vld [vmem:[%s4003_s6] ss:$0 sm:$0xff] }
  0x74   :  { %2707 = vmatprep.subr.bf16.mxu0 %v2706_v60  ;;  %2732 = vmatprep.subr.bf16.mxu1 %v3343_v0  ;;  %v144_v55 = vld [vmem:[#allocation2 + $0x38] sm:$0xff]  ;;  %v3579_v56 = vpack.c.bf16 %v136_v54, %v135_v53  ;;  %v778_v60 = vsel %vm777_vm7, 1, %v3346_v2  ;;  %v3669_v29 = vld [vmem:[%s4004_s7] ss:$0 sm:$0xff] }
  0x75   :  { %773 = vperm.xlu0 %3160, %v771_v25   ;;  %613 = vperm.xlu1 %3161, %v611_v57  }
  0x77   :  { %2709 = vmatpush1.bf16.msra.mxu0 %v2708_v5  ;;  %2734 = vmatpush3.bf16.msra.mxu1 %v3504_v6 }
  0x78   :  { %2711 = vmatprep.subr.bf16.mxu0 %v2710_v9  ;;  %2735 = vmatprep.subr.bf16.mxu1 %v3343_v0 }
  0x79   :  { %933 = vperm.xlu0 %3160, %v931_v30   ;;  %620 = vperm.xlu1 %3161, %v618_v59  }
  0x7b   :  { %2713 = vmatpush1.bf16.msra.mxu0 %v2712_v15  ;;  %2737 = vmatpush3.bf16.msra.mxu1 %v3516_v16 }
  0x7c   :  { %2738 = vmatprep.subr.bf16.mxu0 %v3343_v0  ;;  %2762 = vmatprep.subr.bf16.mxu1 %v3343_v0 }
  0x7d   :  { %1539 = vperm.xlu0 %3160, %v1536_v36   ;;  %780 = vperm.xlu1 %3161, %v778_v60  }
  0x7e   :  { %242 = vmatmul.mubr.f32.vlgmr.msra.gmra.mrb[0].mxu0 %v137_v21  ;;  %2085 = vmatmul.mubr.f32.vlgmr.msra.gmra.mrb[0].mxu1 %v3344_v1 }
  0x7f   :  { %2740 = vmatpush3.bf16.msra.mxu0 %v3522_v22  ;;  %247 = vmatprep.mubr.f32.mxu0 %v3344_v1 }
  0x80   :  { %2741 = vmatprep.subr.bf16.mxu0 %v3343_v0  ;;  %2764 = vmatpush3.bf16.msra.mxu1 %v3481_v11 }
  0x81   :  { %2154 = vmatprep.mubr.msk.f32.mxu1 %vm3345_vm0, %v3344_v1  ;;  %2765 = vmatprep.subr.bf16.mxu1 %v3343_v0 }
  0x82   :  { %248 = vmatmul.mubr.f32.gmra.mrb[2].mxu0 %v138_v26  ;;  %940 = vperm.xlu1 %3161, %v938_v61  }
  0x83   :  { %2743 = vmatpush3.bf16.msra.mxu0 %v3531_v27  ;;  %253 = vmatprep.mubr.f32.mxu0 %v3344_v1 }
  0x84   :  { %2744 = vmatprep.subr.bf16.mxu0 %v3343_v0  ;;  %2767 = vmatpush3.bf16.msra.mxu1 %v3484_v20 }
  0x85   :  { %2768 = vmatprep.subr.bf16.mxu1 %v3343_v0 }
  0x86   :  { %254 = vmatmul.mubr.f32.gmra.mrb[4].mxu0 %v139_v32 }
  0x87   :  { %2746 = vmatpush3.bf16.msra.mxu0 %v3541_v33  ;;  %259 = vmatprep.mubr.f32.mxu0 %v3344_v1 }
  0x88   :  { %2747 = vmatprep.subr.bf16.mxu0 %v3343_v0  ;;  %2770 = vmatpush3.bf16.msra.mxu1 %v3488_v31 }
  0x89   :  { %2771 = vmatprep.subr.bf16.mxu1 %v3343_v0 }
  0x8a   :  { %260 = vmatmul.mubr.f32.gmra.mrb[6].mxu0 %v140_v37 }
  0x8b   :  { %2749 = vmatpush3.bf16.msra.mxu0 %v3551_v38  ;;  %265 = vmatprep.mubr.f32.mxu0 %v3344_v1 }
  0x8c   :  { %2750 = vmatprep.subr.bf16.mxu0 %v3343_v0  ;;  %2773 = vmatpush3.bf16.msra.mxu1 %v3492_v40 }
  0x8d   :  { %2774 = vmatprep.subr.bf16.mxu1 %v3343_v0 }
  0x8e   :  { %266 = vmatmul.mubr.f32.gmra.mrb[8].mxu0 %v141_v42 }
  0x8f   :  { %2752 = vmatpush3.bf16.msra.mxu0 %v3558_v43  ;;  %271 = vmatprep.mubr.f32.mxu0 %v3344_v1 }
  0x90   :  { %2753 = vmatprep.subr.bf16.mxu0 %v3343_v0  ;;  %2776 = vmatpush3.bf16.msra.mxu1 %v3496_v49 }
  0x91   :  { %2777 = vmatprep.subr.bf16.mxu1 %v3343_v0 }
  0x92   :  { %272 = vmatmul.mubr.f32.gmra.mrb[10].mxu0 %v142_v46 }
  0x93   :  { %2755 = vmatpush3.bf16.msra.mxu0 %v3565_v47  ;;  %277 = vmatprep.mubr.f32.mxu0 %v3344_v1 }
  0x94   :  { %2756 = vmatprep.subr.bf16.mxu0 %v3343_v0  ;;  %2779 = vmatpush3.bf16.msra.mxu1 %v3500_v58 }
  0x95   :  { %2780 = vmatprep.subr.bf16.mxu1 %v3343_v0 }
  0x96   :  { %278 = vmatmul.mubr.f32.gmra.mrb[12].mxu0 %v143_v51 }
  0x97   :  { %2758 = vmatpush3.bf16.msra.mxu0 %v3572_v52  ;;  %283 = vmatprep.mubr.f32.mxu0 %v3344_v1 }
  0x98   :  { %2759 = vmatprep.subr.bf16.mxu0 %v3343_v0  ;;  %2782 = vmatpush3.bf16.msra.mxu1 %v3504_v6 }
  0x99   :  { %2783 = vmatprep.subr.bf16.mxu1 %v3343_v0 }
  0x9a   :  { %284 = vmatmul.mubr.f32.gmra.mrb[14].mxu0 %v144_v55 }
  0x9b   :  { %2761 = vmatpush3.bf16.msra.mxu0 %v3579_v56  ;;  %2119 = vmatprep.mubr.msk.f32.mxu0 %vm3345_vm0, %v3344_v1 }
  0x9c   :  { %2786 = vmatprep.subr.bf16.mxu0 %v3343_v0  ;;  %2785 = vmatpush3.bf16.msra.mxu1 %v3516_v16 }
  0x9d   :  { %2810 = vmatprep.subr.bf16.mxu1 %v3343_v0 }
  0x9e   :  { %2120 = vmatmul.mubr.f32.vlgmr.msra.gmra.mrb[16].mxu0 %v3344_v1 }
  0x9f   :  { %2788 = vmatpush3.bf16.msra.mxu0 %v3522_v22  ;;  %2189 = vmatprep.mubr.msk.f32.mxu0 %vm3345_vm0, %v3344_v1 }
  0xa0   :  { %2789 = vmatprep.subr.bf16.mxu0 %v3343_v0 }
  0xa3   :  { %2791 = vmatpush3.bf16.msra.mxu0 %v3531_v27 }
  0xa4   :  { %2792 = vmatprep.subr.bf16.mxu0 %v3343_v0 }
  0xa7   :  { %2794 = vmatpush3.bf16.msra.mxu0 %v3541_v33 }
  0xa8   :  { %2795 = vmatprep.subr.bf16.mxu0 %v3343_v0 }
  0xab   :  { %2797 = vmatpush3.bf16.msra.mxu0 %v3551_v38 }
  0xac   :  { %2798 = vmatprep.subr.bf16.mxu0 %v3343_v0 }
  0xaf   :  { %2800 = vmatpush3.bf16.msra.mxu0 %v3558_v43 }
  0xb0   :  { %2801 = vmatprep.subr.bf16.mxu0 %v3343_v0 }
  0xb3   :  { %2803 = vmatpush3.bf16.msra.mxu0 %v3565_v47 }
  0xb4   :  { %2804 = vmatprep.subr.bf16.mxu0 %v3343_v0 }
  0xb7   :  { %2806 = vmatpush3.bf16.msra.mxu0 %v3572_v52 }
  0xb8   :  { %2807 = vmatprep.subr.bf16.mxu0 %v3343_v0 }
  0xbb   :  { %2809 = vmatpush3.bf16.msra.mxu0 %v3579_v56 }
  0xbc   :  { %2834 = vmatprep.subr.bf16.mxu0 %v3343_v0 }
  0xec   :  { %v3633_v13 = vpop.permute.xlu0 %453 }
  0xed   :  { %vm455_vm9 = vcmp.eq.s32.totalorder %v3633_v13, 1 }
  0xf0   :  { %v3679_v36 = vpop.permute.xlu0 %460 }
  0xf1   :  { %vm462_vm10 = vcmp.eq.s32.totalorder %v3679_v36, 1  ;;  %v1745_v36 = vld [vmem:[%s4006_s9] ss:$0 sm:$0xff] }
  0xf4   :  { %v3705_v45 = vpop.permute.xlu1 %613 }
  0xf5   :  { %vm615_vm11 = vcmp.eq.s32.totalorder %v3705_v45, 1  ;;  %v1549_v45 = vld [vmem:[#allocation10 + $0x30] sm:$0xff] }
  0xf8   :  { %v3730_v57 = vpop.permute.xlu1 %620 }
  0xf9   :  { %vm622_vm12 = vcmp.eq.s32.totalorder %v3730_v57, 1  ;;  %v1546_v57 = vld [vmem:[#allocation10 + $0x18] sm:$0xff] }
 0x151   :  { %v243_v62 = vpop.f32.mrb[0].mxu0  ;;  %v370_v3 = vpop.f32.mrb[0].mxu1 }
 0x152   :  { %v374_v4 = vadd.f32 %v370_v3, %v243_v62  ;;  %v3622_v5 = vpop.f32.mrb[1].mxu0  ;;  %v2086_v7 = vpop.f32.mrb[1].mxu1 }
 0x154   :  { %v375_v9 = vadd.f32 %v3620_v63, %v374_v4 }
 0x155   :  { %v3625_v10 = vpop.f32.mrb[2].mxu0 }
 0x156   :  { %3162 = vtanh.f32 %v375_v9  ;;  %v3627_v8 = vpop.f32.mrb[3].mxu0  ;;  %v3759_v9 = vpop.permute.xlu0 %773 }
 0x157   :  { %vm775_vm13 = vcmp.eq.s32.totalorder %v3759_v9, 1 }
 0x159   :  { %v3629_v2 = vpop.f32.mrb[4].mxu0 }
 0x15a   :  { %v3631_v12 = vpop.f32.mrb[5].mxu0 }
 0x15d   :  { %v3635_v14 = vpop.f32.mrb[6].mxu0 }
 0x15e   :  { %v3637_v15 = vpop.f32.mrb[7].mxu0 }
 0x160   :  { %v3163_v17 = vpop.eup %3162 }
 0x161   :  { %v3640_v18 = vpop.f32.mrb[8].mxu0  ;;  %2155 = vmatmul.mubr.msk.f32.vlgmr.msra.gmra.mrb[2].mxu1 %vm455_vm9, %v3163_v17  ;;  %v456_v48 = vsel %vm455_vm9, %v3163_v17, 0.0 }
 0x162   :  { %v3644_v19 = vpop.f32.mrb[9].mxu0  ;;  %2812 = vmatpush3.bf16.msra.mxu1 %v3481_v11  ;;  %2224 = vmatprep.mubr.msk.f32.mxu1 %vm3345_vm0, %v3344_v1 }
 0x163   :  { %2813 = vmatprep.subr.bf16.mxu1 %v3343_v0 }
 0x165   :  { %v3650_v21 = vpop.f32.mrb[10].mxu0 }
 0x166   :  { %v3652_v23 = vpop.f32.mrb[11].mxu0  ;;  %2815 = vmatpush3.bf16.msra.mxu1 %v3484_v20 }
 0x167   :  { %2816 = vmatprep.subr.bf16.mxu1 %v3343_v0 }
 0x169   :  { %v3656_v24 = vpop.f32.mrb[12].mxu0 }
 0x16a   :  { %v3658_v25 = vpop.f32.mrb[13].mxu0  ;;  %2818 = vmatpush3.bf16.msra.mxu1 %v3488_v31 }
 0x16b   :  { %2819 = vmatprep.subr.bf16.mxu1 %v3343_v0 }
 0x16d   :  { %v3662_v26 = vpop.f32.mrb[14].mxu0 }
 0x16e   :  { %v287_v28 = vpop.f32.mrb[15].mxu0  ;;  %2821 = vmatpush3.bf16.msra.mxu1 %v3492_v40 }
 0x16f   :  { %2822 = vmatprep.subr.bf16.mxu1 %v3343_v0 }
 0x171   :  { %v443_v30 = vpop.f32.mrb[16].mxu0 }
 0x172   :  { %v447_v32 = vadd.f32 %v443_v30, %v287_v28  ;;  %v2121_v34 = vpop.f32.mrb[17].mxu0  ;;  %2824 = vmatpush3.bf16.msra.mxu1 %v3496_v49 }
 0x173   :  { %2825 = vmatprep.subr.bf16.mxu1 %v3343_v0 }
 0x174   :  { %v448_v35 = vadd.f32 %v3669_v29, %v447_v32  ;;  %v3782_v32 = vpop.permute.xlu1 %780 }
 0x175   :  { %vm782_vm14 = vcmp.eq.s32.totalorder %v3782_v32, 1 }
 0x176   :  { %3164 = vtanh.f32 %v448_v35  ;;  %2827 = vmatpush3.bf16.msra.mxu1 %v3500_v58 }
 0x177   :  { %2828 = vmatprep.subr.bf16.mxu1 %v3343_v0 }
 0x17a   :  { %2830 = vmatpush3.bf16.msra.mxu1 %v3504_v6 }
 0x17b   :  { %2831 = vmatprep.subr.bf16.mxu1 %v3343_v0 }
 0x17e   :  { %2833 = vmatpush3.bf16.msra.mxu1 %v3516_v16 }
 0x17f   :  { %2858 = vmatprep.subr.bf16.mxu1 %v3343_v0 }
 0x180   :  { %v3165_v37 = vpop.eup %3164 }
 0x181   :  { %2190 = vmatmul.mubr.msk.f32.vlgmr.msra.gmra.mrb[18].mxu0 %vm462_vm10, %v3165_v37  ;;  %v463_v60 = vsel %vm462_vm10, %v3165_v37, 0.0 }
 0x182   :  { %2836 = vmatpush3.bf16.msra.mxu0 %v3522_v22  ;;  %2259 = vmatprep.mubr.msk.f32.mxu0 %vm3345_vm0, %v3344_v1 }
 0x183   :  { %2837 = vmatprep.subr.bf16.mxu0 %v3343_v0 }
 0x186   :  { %2839 = vmatpush3.bf16.msra.mxu0 %v3531_v27 }
 0x187   :  { %2840 = vmatprep.subr.bf16.mxu0 %v3343_v0 }
 0x18a   :  { %2842 = vmatpush3.bf16.msra.mxu0 %v3541_v33 }
 0x18b   :  { %2843 = vmatprep.subr.bf16.mxu0 %v3343_v0 }
 0x18e   :  { %2845 = vmatpush3.bf16.msra.mxu0 %v3551_v38 }
 0x18f   :  { %2846 = vmatprep.subr.bf16.mxu0 %v3343_v0 }
 0x192   :  { %2848 = vmatpush3.bf16.msra.mxu0 %v3558_v43 }
 0x193   :  { %2849 = vmatprep.subr.bf16.mxu0 %v3343_v0 }
 0x196   :  { %2851 = vmatpush3.bf16.msra.mxu0 %v3565_v47 }
 0x197   :  { %2852 = vmatprep.subr.bf16.mxu0 %v3343_v0 }
 0x19a   :  { %2854 = vmatpush3.bf16.msra.mxu0 %v3572_v52 }
 0x19b   :  { %2855 = vmatprep.subr.bf16.mxu0 %v3343_v0 }
 0x19e   :  { %2857 = vmatpush3.bf16.msra.mxu0 %v3579_v56 }
 0x19f   :  { %2882 = vmatprep.subr.bf16.mxu0 %v3343_v0 }
 0x234   :  { %v530_v39 = vpop.f32.mrb[2].mxu1 }
 0x235   :  { %v534_v41 = vadd.f32 %v530_v39, %v3625_v10  ;;  %v2156_v42 = vpop.f32.mrb[3].mxu1 }
 0x236   :  { %v3809_v42 = vpop.permute.xlu0 %933 }
 0x237   :  { %v535_v44 = vadd.f32 %v3620_v63, %v534_v41  ;;  %vm935_vm15 = vcmp.eq.s32.totalorder %v3809_v42, 1  ;;  %v1550_v42 = vld [vmem:[#allocation10 + $0x38] sm:$0xff] }
 0x239   :  { %3166 = vtanh.f32 %v535_v44 }
 0x243   :  { %v3167_v46 = vpop.eup %3166 }
 0x244   :  { %v616_v50 = vsel %vm615_vm11, %v3167_v46, %v456_v48 }
 0x245   :  { %2225 = vmatmul.mubr.f32.vlgmr.msra.gmra.mrb[4].mxu1 %v616_v50 }
 0x246   :  { %2860 = vmatpush3.bf16.msra.mxu1 %v3481_v11  ;;  %2294 = vmatprep.mubr.msk.f32.mxu1 %vm3345_vm0, %v3344_v1 }
 0x247   :  { %2861 = vmatprep.subr.bf16.mxu1 %v3343_v0 }
 0x24a   :  { %2863 = vmatpush3.bf16.msra.mxu1 %v3484_v20 }
 0x24b   :  { %2864 = vmatprep.subr.bf16.mxu1 %v3343_v0 }
 0x24e   :  { %2866 = vmatpush3.bf16.msra.mxu1 %v3488_v31 }
 0x24f   :  { %2867 = vmatprep.subr.bf16.mxu1 %v3343_v0 }
 0x252   :  { %2869 = vmatpush3.bf16.msra.mxu1 %v3492_v40 }
 0x253   :  { %2870 = vmatprep.subr.bf16.mxu1 %v3343_v0 }
 0x254   :  { %v603_v51 = vpop.f32.mrb[18].mxu0 }
 0x255   :  { %v607_v53 = vadd.f32 %v603_v51, %v3658_v25  ;;  %v2191_v54 = vpop.f32.mrb[19].mxu0 }
 0x256   :  { %2872 = vmatpush3.bf16.msra.mxu1 %v3496_v49 }
 0x257   :  { %v608_v55 = vadd.f32 %v3669_v29, %v607_v53  ;;  %2873 = vmatprep.subr.bf16.mxu1 %v3343_v0  ;;  %v941_v53 = vpop.permute.xlu1 %940 }
 0x258   :  { %vm942_vm1 = vcmp.eq.s32.totalorder %v941_v53, 1 }
 0x259   :  { %3168 = vtanh.f32 %v608_v55 }
 0x25a   :  { %2875 = vmatpush3.bf16.msra.mxu1 %v3500_v58 }
 0x25b   :  { %2876 = vmatprep.subr.bf16.mxu1 %v3343_v0 }
 0x25e   :  { %2878 = vmatpush3.bf16.msra.mxu1 %v3504_v6 }
 0x25f   :  { %2879 = vmatprep.subr.bf16.mxu1 %v3343_v0 }
 0x262   :  { %2881 = vmatpush3.bf16.msra.mxu1 %v3516_v16 }
 0x263   :  { %v3169_v59 = vpop.eup %3168  ;;  %2906 = vmatprep.subr.bf16.mxu1 %v3343_v0 }
 0x264   :  { %v623_v61 = vsel %vm622_vm12, %v3169_v59, %v463_v60 }
 0x265   :  { %2260 = vmatmul.mubr.f32.vlgmr.msra.gmra.mrb[20].mxu0 %v623_v61 }
 0x266   :  { %2884 = vmatpush3.bf16.msra.mxu0 %v3522_v22  ;;  %2329 = vmatprep.mubr.msk.f32.mxu0 %vm3345_vm0, %v3344_v1 }
 0x267   :  { %2885 = vmatprep.subr.bf16.mxu0 %v3343_v0 }
 0x26a   :  { %2887 = vmatpush3.bf16.msra.mxu0 %v3531_v27 }
 0x26b   :  { %2888 = vmatprep.subr.bf16.mxu0 %v3343_v0 }
 0x26e   :  { %2890 = vmatpush3.bf16.msra.mxu0 %v3541_v33 }
 0x26f   :  { %2891 = vmatprep.subr.bf16.mxu0 %v3343_v0 }
 0x272   :  { %2893 = vmatpush3.bf16.msra.mxu0 %v3551_v38 }
 0x273   :  { %2894 = vmatprep.subr.bf16.mxu0 %v3343_v0 }
 0x276   :  { %2896 = vmatpush3.bf16.msra.mxu0 %v3558_v43 }
 0x277   :  { %2897 = vmatprep.subr.bf16.mxu0 %v3343_v0 }
 0x27a   :  { %2899 = vmatpush3.bf16.msra.mxu0 %v3565_v47 }
 0x27b   :  { %2900 = vmatprep.subr.bf16.mxu0 %v3343_v0 }
 0x27e   :  { %2902 = vmatpush3.bf16.msra.mxu0 %v3572_v52 }
 0x27f   :  { %2903 = vmatprep.subr.bf16.mxu0 %v3343_v0 }
 0x282   :  { %2905 = vmatpush3.bf16.msra.mxu0 %v3579_v56 }
 0x283   :  { %2930 = vmatprep.subr.bf16.mxu0 %v3343_v0 }
 0x318   :  { %v690_v62 = vpop.f32.mrb[4].mxu1 }
 0x319   :  { %v694_v3 = vadd.f32 %v690_v62, %v3629_v2  ;;  %v2226_v4 = vpop.f32.mrb[5].mxu1 }
 0x31b   :  { %v695_v7 = vadd.f32 %v3620_v63, %v694_v3 }
 0x31d   :  { %3170 = vtanh.f32 %v695_v7 }
 0x327   :  { %v3171_v10 = vpop.eup %3170 }
 0x328   :  { %v776_v17 = vsel %vm775_vm13, %v3171_v10, %v616_v50 }
 0x329   :  { %2295 = vmatmul.mubr.f32.vlgmr.msra.gmra.mrb[6].mxu1 %v776_v17 }
 0x32a   :  { %2908 = vmatpush3.bf16.msra.mxu1 %v3481_v11  ;;  %2364 = vmatprep.mubr.msk.f32.mxu1 %vm3345_vm0, %v3344_v1 }
 0x32b   :  { %2909 = vmatprep.subr.bf16.mxu1 %v3343_v0 }
 0x32e   :  { %2911 = vmatpush3.bf16.msra.mxu1 %v3484_v20 }
 0x32f   :  { %2912 = vmatprep.subr.bf16.mxu1 %v3343_v0 }
 0x332   :  { %2914 = vmatpush3.bf16.msra.mxu1 %v3488_v31 }
 0x333   :  { %2915 = vmatprep.subr.bf16.mxu1 %v3343_v0 }
 0x336   :  { %2917 = vmatpush3.bf16.msra.mxu1 %v3492_v40 }
 0x337   :  { %2918 = vmatprep.subr.bf16.mxu1 %v3343_v0 }
 0x338   :  { %v763_v2 = vpop.f32.mrb[20].mxu0 }
 0x339   :  { %v767_v25 = vadd.f32 %v763_v2, %v3652_v23  ;;  %v2261_v28 = vpop.f32.mrb[21].mxu0 }
 0x33a   :  { %2920 = vmatpush3.bf16.msra.mxu1 %v3496_v49 }
 0x33b   :  { %v768_v30 = vadd.f32 %v3669_v29, %v767_v25  ;;  %2921 = vmatprep.subr.bf16.mxu1 %v3343_v0 }
 0x33d   :  { %3172 = vtanh.f32 %v768_v30 }
 0x33e   :  { %2923 = vmatpush3.bf16.msra.mxu1 %v3500_v58 }
 0x33f   :  { %2924 = vmatprep.subr.bf16.mxu1 %v3343_v0 }
 0x342   :  { %2926 = vmatpush3.bf16.msra.mxu1 %v3504_v6 }
 0x343   :  { %2927 = vmatprep.subr.bf16.mxu1 %v3343_v0 }
 0x346   :  { %2929 = vmatpush3.bf16.msra.mxu1 %v3516_v16 }
 0x347   :  { %v3173_v23 = vpop.eup %3172  ;;  %2954 = vmatprep.subr.bf16.mxu1 %v3343_v0 }
 0x348   :  { %v783_v34 = vsel %vm782_vm14, %v3173_v23, %v623_v61 }
 0x349   :  { %2330 = vmatmul.mubr.f32.vlgmr.msra.gmra.mrb[22].mxu0 %v783_v34 }
 0x34a   :  { %2932 = vmatpush3.bf16.msra.mxu0 %v3522_v22  ;;  %2399 = vmatprep.mubr.msk.f32.mxu0 %vm3345_vm0, %v3344_v1 }
 0x34b   :  { %2933 = vmatprep.subr.bf16.mxu0 %v3343_v0 }
 0x34e   :  { %2935 = vmatpush3.bf16.msra.mxu0 %v3531_v27 }
 0x34f   :  { %2936 = vmatprep.subr.bf16.mxu0 %v3343_v0 }
 0x352   :  { %2938 = vmatpush3.bf16.msra.mxu0 %v3541_v33 }
 0x353   :  { %2939 = vmatprep.subr.bf16.mxu0 %v3343_v0 }
 0x356   :  { %2941 = vmatpush3.bf16.msra.mxu0 %v3551_v38 }
 0x357   :  { %2942 = vmatprep.subr.bf16.mxu0 %v3343_v0 }
 0x35a   :  { %2944 = vmatpush3.bf16.msra.mxu0 %v3558_v43 }
 0x35b   :  { %2945 = vmatprep.subr.bf16.mxu0 %v3343_v0 }
 0x35e   :  { %2947 = vmatpush3.bf16.msra.mxu0 %v3565_v47 }
 0x35f   :  { %2948 = vmatprep.subr.bf16.mxu0 %v3343_v0 }
 0x362   :  { %2950 = vmatpush3.bf16.msra.mxu0 %v3572_v52 }
 0x363   :  { %2951 = vmatprep.subr.bf16.mxu0 %v3343_v0 }
 0x366   :  { %2953 = vmatpush3.bf16.msra.mxu0 %v3579_v56 }
 0x367   :  { %2978 = vmatprep.subr.bf16.mxu0 %v3343_v0 }
 0x3fc   :  { %v850_v35 = vpop.f32.mrb[6].mxu1 }
 0x3fd   :  { %v854_v37 = vadd.f32 %v850_v35, %v3635_v14  ;;  %v2296_v39 = vpop.f32.mrb[7].mxu1 }
 0x3fe   :  { %v1548_v39 = vld [vmem:[#allocation10 + $0x28] sm:$0xff] }
 0x3ff   :  { %v855_v41 = vadd.f32 %v3620_v63, %v854_v37 }
 0x401   :  { %3174 = vtanh.f32 %v855_v41 }
 0x40b   :  { %v3175_v44 = vpop.eup %3174 }
 0x40c   :  { %v936_v46 = vsel %vm935_vm15, %v3175_v44, %v776_v17  ;;  %v3132_v44 = vpack.c.bf16 %v1550_v42, %v1549_v45 }
 0x40d   :  { %2365 = vmatmul.mubr.f32.vlgmr.msra.gmra.mrb[8].mxu1 %v936_v46 }
 0x40e   :  { %2956 = vmatpush3.bf16.msra.mxu1 %v3481_v11  ;;  %2434 = vmatprep.mubr.msk.f32.mxu1 %vm3345_vm0, %v3344_v1 }
 0x40f   :  { %2957 = vmatprep.subr.bf16.mxu1 %v3343_v0 }
 0x412   :  { %2959 = vmatpush3.bf16.msra.mxu1 %v3484_v20 }
 0x413   :  { %2960 = vmatprep.subr.bf16.mxu1 %v3343_v0 }
 0x416   :  { %2962 = vmatpush3.bf16.msra.mxu1 %v3488_v31 }
 0x417   :  { %2963 = vmatprep.subr.bf16.mxu1 %v3343_v0 }
 0x41a   :  { %2965 = vmatpush3.bf16.msra.mxu1 %v3492_v40 }
 0x41b   :  { %2966 = vmatprep.subr.bf16.mxu1 %v3343_v0 }
 0x41c   :  { %v923_v14 = vpop.f32.mrb[22].mxu0 }
 0x41d   :  { %v927_v48 = vadd.f32 %v923_v14, %v3644_v19  ;;  %v2331_v50 = vpop.f32.mrb[23].mxu0  ;;  %v1552_v14 = vld [vmem:[#allocation10 + $0x48] sm:$0xff] }
 0x41e   :  { %2968 = vmatpush3.bf16.msra.mxu1 %v3496_v49  ;;  %v1554_v50 = vld [vmem:[#allocation10 + $0x58] sm:$0xff] }
 0x41f   :  { %v928_v51 = vadd.f32 %v3669_v29, %v927_v48  ;;  %2969 = vmatprep.subr.bf16.mxu1 %v3343_v0  ;;  %v1553_v48 = vld [vmem:[#allocation10 + $0x50] sm:$0xff] }
 0x420   :  { %v3138_v53 = vpack.c.bf16 %v1554_v50, %v1553_v48 }
 0x421   :  { %3176 = vtanh.f32 %v928_v51  ;;  %v1555_v51 = vld [vmem:[#allocation10 + $0x60] sm:$0xff] }
 0x422   :  { %2971 = vmatpush3.bf16.msra.mxu1 %v3500_v58 }
 0x423   :  { %2972 = vmatprep.subr.bf16.mxu1 %v3343_v0 }
 0x426   :  { %2974 = vmatpush3.bf16.msra.mxu1 %v3504_v6 }
 0x427   :  { %2975 = vmatprep.subr.bf16.mxu1 %v3343_v0 }
 0x42a   :  { %2977 = vmatpush3.bf16.msra.mxu1 %v3516_v16 }
 0x42b   :  { %v3177_v19 = vpop.eup %3176  ;;  %3002 = vmatprep.subr.bf16.mxu1 %v3343_v0 }
 0x42c   :  { %v943_v54 = vsel %vm942_vm1, %v3177_v19, %v783_v34  ;;  %v1556_v19 = vld [vmem:[#allocation10 + $0x68] sm:$0xff] }
 0x42d   :  { %2400 = vmatmul.mubr.f32.vlgmr.msra.gmra.mrb[24].mxu0 %v943_v54 }
 0x42e   :  { %2980 = vmatpush3.bf16.msra.mxu0 %v3522_v22  ;;  %2469 = vmatprep.mubr.msk.f32.mxu0 %vm3345_vm0, %v3344_v1 }
 0x42f   :  { %2981 = vmatprep.subr.bf16.mxu0 %v3343_v0 }
 0x432   :  { %2983 = vmatpush3.bf16.msra.mxu0 %v3531_v27 }
 0x433   :  { %2984 = vmatprep.subr.bf16.mxu0 %v3343_v0 }
 0x436   :  { %2986 = vmatpush3.bf16.msra.mxu0 %v3541_v33 }
 0x437   :  { %2987 = vmatprep.subr.bf16.mxu0 %v3343_v0 }
 0x43a   :  { %2989 = vmatpush3.bf16.msra.mxu0 %v3551_v38 }
 0x43b   :  { %2990 = vmatprep.subr.bf16.mxu0 %v3343_v0 }
 0x43e   :  { %2992 = vmatpush3.bf16.msra.mxu0 %v3558_v43 }
 0x43f   :  { %2993 = vmatprep.subr.bf16.mxu0 %v3343_v0 }
 0x442   :  { %2995 = vmatpush3.bf16.msra.mxu0 %v3565_v47 }
 0x443   :  { %2996 = vmatprep.subr.bf16.mxu0 %v3343_v0 }
 0x446   :  { %2998 = vmatpush3.bf16.msra.mxu0 %v3572_v52 }
 0x447   :  { %2999 = vmatprep.subr.bf16.mxu0 %v3343_v0 }
 0x44a   :  { %3001 = vmatpush3.bf16.msra.mxu0 %v3579_v56 }
 0x44b   :  { %3026 = vmatprep.subr.bf16.mxu0 %v3343_v0 }
 0x4e0   :  { %v1010_v55 = vpop.f32.mrb[8].mxu1 }
 0x4e1   :  { %v1014_v59 = vadd.f32 %v1010_v55, %v3640_v18  ;;  %v2366_v60 = vpop.f32.mrb[9].mxu1  ;;  %v1560_v55 = vld [vmem:[#allocation10 + $0x88] sm:$0xff] }
 0x4e3   :  { %v1015_v61 = vadd.f32 %v3620_v63, %v1014_v59  ;;  %v3141_v59 = vpack.c.bf16 %v1556_v19, %v1555_v51 }
 0x4e5   :  { %3178 = vtanh.f32 %v1015_v61  ;;  %v1557_v61 = vld [vmem:[#allocation10 + $0x70] sm:$0xff] }
 0x4ef   :  { %v3179_v62 = vpop.eup %3178 }
 0x4f0   :  { %v1090_v3 = vsel %vm942_vm1, %v3179_v62, %v936_v46  ;;  %v1551_v46 = vld [vmem:[#allocation10 + $0x40] sm:$0xff]  ;;  %v1558_v62 = vld [vmem:[#allocation10 + $0x78] sm:$0xff] }
 0x4f1   :  { %2435 = vmatmul.mubr.f32.vlgmr.msra.gmra.mrb[10].mxu1 %v1090_v3 }
 0x4f2   :  { %3004 = vmatpush3.bf16.msra.mxu1 %v3481_v11  ;;  %2504 = vmatprep.mubr.msk.f32.mxu1 %vm3345_vm0, %v3344_v1 }
 0x4f3   :  { %3005 = vmatprep.subr.bf16.mxu1 %v3343_v0 }
 0x4f6   :  { %3007 = vmatpush3.bf16.msra.mxu1 %v3484_v20 }
 0x4f7   :  { %3008 = vmatprep.subr.bf16.mxu1 %v3343_v0 }
 0x4fa   :  { %3010 = vmatpush3.bf16.msra.mxu1 %v3488_v31 }
 0x4fb   :  { %3011 = vmatprep.subr.bf16.mxu1 %v3343_v0 }
 0x4fe   :  { %3013 = vmatpush3.bf16.msra.mxu1 %v3492_v40 }
 0x4ff   :  { %3014 = vmatprep.subr.bf16.mxu1 %v3343_v0 }
 0x500   :  { %v1083_v18 = vpop.f32.mrb[24].mxu0 }
 0x501   :  { %v1087_v4 = vadd.f32 %v1083_v18, %v3637_v15  ;;  %v2401_v7 = vpop.f32.mrb[25].mxu0  ;;  %v1561_v18 = vld [vmem:[#allocation10 + $0x90] sm:$0xff] }
 0x502   :  { %3016 = vmatpush3.bf16.msra.mxu1 %v3496_v49  ;;  %v1563_v7 = vld [vmem:[#allocation10 + $0xa0] sm:$0xff] }
 0x503   :  { %v1088_v10 = vadd.f32 %v3669_v29, %v1087_v4  ;;  %3017 = vmatprep.subr.bf16.mxu1 %v3343_v0  ;;  %v1562_v4 = vld [vmem:[#allocation10 + $0x98] sm:$0xff] }
 0x505   :  { %3180 = vtanh.f32 %v1088_v10  ;;  %v3102_v10 = vpack.c.bf16 %v1562_v4, %v1561_v18 }
 0x506   :  { %3019 = vmatpush3.bf16.msra.mxu1 %v3500_v58 }
 0x507   :  { %3020 = vmatprep.subr.bf16.mxu1 %v3343_v0 }
 0x50a   :  { %3022 = vmatpush3.bf16.msra.mxu1 %v3504_v6 }
 0x50b   :  { %3023 = vmatprep.subr.bf16.mxu1 %v3343_v0 }
 0x50e   :  { %3025 = vmatpush3.bf16.msra.mxu1 %v3516_v16 }
 0x50f   :  { %v3181_v17 = vpop.eup %3180  ;;  %3050 = vmatprep.subr.bf16.mxu1 %v3343_v0 }
 0x510   :  { %v1091_v15 = vsel %vm935_vm15, %v3181_v17, %v943_v54  ;;  %v1559_v54 = vld [vmem:[#allocation10 + $0x80] sm:$0xff]  ;;  %v1564_v17 = vld [vmem:[#allocation10 + $0xa8] sm:$0xff] }
 0x511   :  { %2470 = vmatmul.mubr.f32.vlgmr.msra.gmra.mrb[26].mxu0 %v1091_v15  ;;  %v3099_v60 = vpack.c.bf16 %v1560_v55, %v1559_v54 }
 0x512   :  { %3028 = vmatpush3.bf16.msra.mxu0 %v3522_v22  ;;  %2539 = vmatprep.mubr.msk.f32.mxu0 %vm3345_vm0, %v3344_v1 }
 0x513   :  { %3029 = vmatprep.subr.bf16.mxu0 %v3343_v0 }
 0x516   :  { %3031 = vmatpush3.bf16.msra.mxu0 %v3531_v27 }
 0x517   :  { %3032 = vmatprep.subr.bf16.mxu0 %v3343_v0 }
 0x51a   :  { %3034 = vmatpush3.bf16.msra.mxu0 %v3541_v33 }
 0x51b   :  { %3035 = vmatprep.subr.bf16.mxu0 %v3343_v0 }
 0x51e   :  { %3037 = vmatpush3.bf16.msra.mxu0 %v3551_v38 }
 0x51f   :  { %3038 = vmatprep.subr.bf16.mxu0 %v3343_v0 }
 0x522   :  { %3040 = vmatpush3.bf16.msra.mxu0 %v3558_v43 }
 0x523   :  { %3041 = vmatprep.subr.bf16.mxu0 %v3343_v0 }
 0x526   :  { %3043 = vmatpush3.bf16.msra.mxu0 %v3565_v47 }
 0x527   :  { %3044 = vmatprep.subr.bf16.mxu0 %v3343_v0 }
 0x52a   :  { %3046 = vmatpush3.bf16.msra.mxu0 %v3572_v52 }
 0x52b   :  { %3047 = vmatprep.subr.bf16.mxu0 %v3343_v0 }
 0x52e   :  { %3049 = vmatpush3.bf16.msra.mxu0 %v3579_v56 }
 0x52f   :  { %3074 = vmatprep.subr.bf16.mxu0 %v3343_v0 }
 0x5c4   :  { %v1158_v2 = vpop.f32.mrb[10].mxu1 }
 0x5c5   :  { %v1162_v25 = vadd.f32 %v1158_v2, %v3650_v21  ;;  %v2436_v28 = vpop.f32.mrb[11].mxu1  ;;  %v1565_v2 = vld [vmem:[#allocation10 + $0xb0] sm:$0xff] }
 0x5c7   :  { %v1163_v30 = vadd.f32 %v3620_v63, %v1162_v25  ;;  %v1566_v25 = vld [vmem:[#allocation10 + $0xb8] sm:$0xff] }
 0x5c8   :  { %v3108_v28 = vpack.c.bf16 %v1566_v25, %v1565_v2 }
 0x5c9   :  { %3182 = vtanh.f32 %v1163_v30  ;;  %v1567_v30 = vld [vmem:[#allocation10 + $0xc0] sm:$0xff] }
 0x5d3   :  { %v3183_v23 = vpop.eup %3182 }
 0x5d4   :  { %v1238_v34 = vsel %vm782_vm14, %v3183_v23, %v1090_v3  ;;  %v3144_v3 = vpack.c.bf16 %v1558_v62, %v1557_v61  ;;  %v1568_v23 = vld [vmem:[#allocation10 + $0xc8] sm:$0xff] }
 0x5d5   :  { %2505 = vmatmul.mubr.f32.vlgmr.msra.gmra.mrb[12].mxu1 %v1238_v34 }
 0x5d6   :  { %3052 = vmatpush3.bf16.msra.mxu1 %v3481_v11  ;;  %2574 = vmatprep.mubr.msk.f32.mxu1 %vm3345_vm0, %v3344_v1 }
 0x5d7   :  { %3053 = vmatprep.subr.bf16.mxu1 %v3343_v0 }
 0x5da   :  { %3055 = vmatpush3.bf16.msra.mxu1 %v3484_v20 }
 0x5db   :  { %3056 = vmatprep.subr.bf16.mxu1 %v3343_v0 }
 0x5de   :  { %3058 = vmatpush3.bf16.msra.mxu1 %v3488_v31 }
 0x5df   :  { %3059 = vmatprep.subr.bf16.mxu1 %v3343_v0 }
 0x5e2   :  { %3061 = vmatpush3.bf16.msra.mxu1 %v3492_v40 }
 0x5e3   :  { %3062 = vmatprep.subr.bf16.mxu1 %v3343_v0 }
 0x5e4   :  { %v1231_v21 = vpop.f32.mrb[26].mxu0 }
 0x5e5   :  { %v1235_v11 = vadd.f32 %v1231_v21, %v3631_v12  ;;  %v2471_v32 = vpop.f32.mrb[27].mxu0  ;;  %v1569_v21 = vld [vmem:[#allocation10 + $0xd0] sm:$0xff] }
 0x5e6   :  { %3064 = vmatpush3.bf16.msra.mxu1 %v3496_v49 }
 0x5e7   :  { %v1236_v35 = vadd.f32 %v3669_v29, %v1235_v11  ;;  %3065 = vmatprep.subr.bf16.mxu1 %v3343_v0  ;;  %v1570_v11 = vld [vmem:[#allocation10 + $0xd8] sm:$0xff] }
 0x5e8   :  { %v3114_v32 = vpack.c.bf16 %v1570_v11, %v1569_v21 }
 0x5e9   :  { %3184 = vtanh.f32 %v1236_v35  ;;  %v1571_v35 = vld [vmem:[#allocation10 + $0xe0] sm:$0xff] }
 0x5ea   :  { %3067 = vmatpush3.bf16.msra.mxu1 %v3500_v58 }
 0x5eb   :  { %3068 = vmatprep.subr.bf16.mxu1 %v3343_v0 }
 0x5ee   :  { %3070 = vmatpush3.bf16.msra.mxu1 %v3504_v6 }
 0x5ef   :  { %3071 = vmatprep.subr.bf16.mxu1 %v3343_v0 }
 0x5f2   :  { %3073 = vmatpush3.bf16.msra.mxu1 %v3516_v16 }
 0x5f3   :  { %v3185_v20 = vpop.eup %3184  ;;  %3098 = vmatprep.subr.bf16.mxu1 %v3343_v0 }
 0x5f4   :  { %v1239_v31 = vsel %vm775_vm13, %v3185_v20, %v1091_v15  ;;  %v3105_v15 = vpack.c.bf16 %v1564_v17, %v1563_v7  ;;  %v1572_v20 = vld [vmem:[#allocation10 + $0xe8] sm:$0xff] }
 0x5f5   :  { %2540 = vmatmul.mubr.f32.vlgmr.msra.gmra.mrb[28].mxu0 %v1239_v31 }
 0x5f6   :  { %3076 = vmatpush3.bf16.msra.mxu0 %v3522_v22  ;;  %2609 = vmatprep.mubr.msk.f32.mxu0 %vm3345_vm0, %v3344_v1 }
 0x5f7   :  { %3077 = vmatprep.subr.bf16.mxu0 %v3343_v0 }
 0x5fa   :  { %3079 = vmatpush3.bf16.msra.mxu0 %v3531_v27 }
 0x5fb   :  { %3080 = vmatprep.subr.bf16.mxu0 %v3343_v0 }
 0x5fe   :  { %3082 = vmatpush3.bf16.msra.mxu0 %v3541_v33 }
 0x5ff   :  { %3083 = vmatprep.subr.bf16.mxu0 %v3343_v0 }
 0x602   :  { %3085 = vmatpush3.bf16.msra.mxu0 %v3551_v38 }
 0x603   :  { %3086 = vmatprep.subr.bf16.mxu0 %v3343_v0 }
 0x606   :  { %3088 = vmatpush3.bf16.msra.mxu0 %v3558_v43 }
 0x607   :  { %3089 = vmatprep.subr.bf16.mxu0 %v3343_v0 }
 0x60a   :  { %3091 = vmatpush3.bf16.msra.mxu0 %v3565_v47  ;;  %v1543_v47 = vld [vmem:[#allocation10] sm:$0xff] }
 0x60b   :  { %3092 = vmatprep.subr.bf16.mxu0 %v3343_v0 }
 0x60e   :  { %3094 = vmatpush3.bf16.msra.mxu0 %v3572_v52  ;;  %v1544_v52 = vld [vmem:[#allocation10 + $0x8] sm:$0xff] }
 0x60f   :  { %3095 = vmatprep.subr.bf16.mxu0 %v3343_v0 }
 0x612   :  { %3097 = vmatpush3.bf16.msra.mxu0 %v3579_v56  ;;  %v3123_v56 = vpack.c.bf16 %v1544_v52, %v1543_v47 }
 0x613   :  { %3122 = vmatprep.subr.bf16.mxu0 %v3343_v0 }
 0x6a8   :  { %v1306_v40 = vpop.f32.mrb[12].mxu1 }
 0x6a9   :  { %v1310_v49 = vadd.f32 %v1306_v40, %v3656_v24  ;;  %v2506_v58 = vpop.f32.mrb[13].mxu1  ;;  %v1545_v24 = vld [vmem:[#allocation10 + $0x10] sm:$0xff] }
 0x6aa   :  { %v3126_v37 = vpack.c.bf16 %v1546_v57, %v1545_v24  ;;  %v1573_v40 = vld [vmem:[#allocation10 + $0xf0] sm:$0xff] }
 0x6ab   :  { %v1311_v6 = vadd.f32 %v3620_v63, %v1310_v49  ;;  %v1574_v49 = vld [vmem:[#allocation10 + $0xf8] sm:$0xff] }
 0x6ac   :  { %v3120_v58 = vpack.c.bf16 %v1574_v49, %v1573_v40 }
 0x6ad   :  { %3186 = vtanh.f32 %v1311_v6 }
 0x6b7   :  { %v3187_v16 = vpop.eup %3186 }
 0x6b8   :  { %v3944_v22 = vsel %vm622_vm12, %v3187_v16, %v1238_v34  ;;  %v3111_v34 = vpack.c.bf16 %v1568_v23, %v1567_v30 }
 0x6b9   :  { %2575 = vmatmul.mubr.f32.vlgmr.msra.gmra.mrb[14].mxu1 %v3944_v22 }
 0x6ba   :  { %2644 = vmatprep.mubr.msk.f32.mxu1 %vm3345_vm0, %v3344_v1  ;;  %3100 = vmatpush3.bf16.msra.mxu1 %v3099_v60 }
 0x6bb   :  { %3101 = vmatprep.subr.bf16.mxu1 %v3343_v0 }
 0x6be   :  { %3103 = vmatpush3.bf16.msra.mxu1 %v3102_v10 }
 0x6bf   :  { %3104 = vmatprep.subr.bf16.mxu1 %v3343_v0 }
 0x6c2   :  { %3106 = vmatpush3.bf16.msra.mxu1 %v3105_v15 }
 0x6c3   :  { %3107 = vmatprep.subr.bf16.mxu1 %v3343_v0 }
 0x6c6   :  { %3109 = vmatpush3.bf16.msra.mxu1 %v3108_v28 }
 0x6c7   :  { %3110 = vmatprep.subr.bf16.mxu1 %v3343_v0 }
 0x6c8   :  { %v1379_v27 = vpop.f32.mrb[28].mxu0 }
 0x6c9   :  { %v1383_v33 = vadd.f32 %v1379_v27, %v3627_v8  ;;  %v2541_v38 = vpop.f32.mrb[29].mxu0  ;;  %v1547_v8 = vld [vmem:[#allocation10 + $0x20] sm:$0xff] }
 0x6ca   :  { %v3129_v41 = vpack.c.bf16 %v1548_v39, %v1547_v8  ;;  %3112 = vmatpush3.bf16.msra.mxu1 %v3111_v34 }
 0x6cb   :  { %v1384_v43 = vadd.f32 %v3669_v29, %v1383_v33  ;;  %3113 = vmatprep.subr.bf16.mxu1 %v3343_v0 }
 0x6cd   :  { %3188 = vtanh.f32 %v1384_v43  ;;  %v1540_v43 = vpop.permute.xlu0 %1539 }
 0x6ce   :  { %3115 = vmatpush3.bf16.msra.mxu1 %v3114_v32 }
 0x6cf   :  { %3116 = vmatprep.subr.bf16.mxu1 %v3343_v0 }
 0x6d7   :  { %v3189_v12 = vpop.eup %3188 }
 0x6d8   :  { %v3953_v9 = vsel %vm615_vm11, %v3189_v12, %v1239_v31  ;;  %v3117_v31 = vpack.c.bf16 %v1572_v20, %v1571_v35 }
 0x6d9   :  { %2610 = vmatmul.mubr.f32.vlgmr.msra.gmra.mrb[30].mxu0 %v3953_v9 }
 0x6da   :  { %3124 = vmatpush3.bf16.msra.mxu0 %v3123_v56  ;;  %2679 = vmatprep.mubr.msk.f32.mxu0 %vm3345_vm0, %v3344_v1  ;;  %v3135_v1 = vpack.c.bf16 %v1552_v14, %v1551_v46 }
 0x6db   :  { %3125 = vmatprep.subr.bf16.mxu0 %v3343_v0  ;;  %3118 = vmatpush3.bf16.msra.mxu1 %v3117_v31 }
 0x6dc   :  { %3119 = vmatprep.subr.bf16.mxu1 %v3343_v0 }
 0x6de   :  { %3127 = vmatpush3.bf16.msra.mxu0 %v3126_v37 }
 0x6df   :  { %3128 = vmatprep.subr.bf16.mxu0 %v3343_v0  ;;  %3121 = vmatpush3.bf16.msra.mxu1 %v3120_v58 }
 0x6e2   :  { %3130 = vmatpush3.bf16.msra.mxu0 %v3129_v41 }
 0x6e3   :  { %3131 = vmatprep.subr.bf16.mxu0 %v3343_v0 }
 0x6e6   :  { %3133 = vmatpush3.bf16.msra.mxu0 %v3132_v44 }
 0x6e7   :  { %3134 = vmatprep.subr.bf16.mxu0 %v3343_v0 }
 0x6ea   :  { %3136 = vmatpush3.bf16.msra.mxu0 %v3135_v1 }
 0x6eb   :  { %3137 = vmatprep.subr.bf16.mxu0 %v3343_v0 }
 0x6ee   :  { %3139 = vmatpush3.bf16.msra.mxu0 %v3138_v53 }
 0x6ef   :  { %3140 = vmatprep.subr.bf16.mxu0 %v3343_v0 }
 0x6f2   :  { %3142 = vmatpush3.bf16.msra.mxu0 %v3141_v59 }
 0x6f3   :  { %3143 = vmatprep.subr.bf16.mxu0 %v3343_v0 }
 0x6f6   :  { %3145 = vmatpush3.bf16.msra.mxu0 %v3144_v3 }
 0x78c   :  { %v1454_v6 = vpop.f32.mrb[14].mxu1 }
 0x78d   :  { %v1458_v16 = vadd.f32 %v1454_v6, %v3662_v26  ;;  %v2576_v27 = vpop.f32.mrb[15].mxu1 }
 0x78f   :  { %v1459_v33 = vadd.f32 %v3620_v63, %v1458_v16 }
 0x791   :  { %3190 = vtanh.f32 %v1459_v33 }
 0x79b   :  { %v3191_v38 = vpop.eup %3190 }
 0x79c   :  { %v1534_v47 = vsel %vm462_vm10, %v3191_v38, %v3944_v22 }
 0x79d   :  { %v1542_v52 = vmul.f32 %v1540_v43, %v1534_v47 }
 0x79f   :  { %2680 = vmatmul.mubr.f32.vlgmr.msra.gmra.mrb[32].mxu0 %v1542_v52 }
 0x7ac   :  { %v1527_v56 = vpop.f32.mrb[30].mxu0 }
 0x7ad   :  { %v1531_v12 = vadd.f32 %v1527_v56, %v3622_v5  ;;  %v2611_v0 = vpop.f32.mrb[31].mxu0 }
 0x7af   :  { %v1532_v24 = vadd.f32 %v3669_v29, %v1531_v12 }
 0x7b1   :  { %3192 = vtanh.f32 %v1532_v24 }
 0x7bb   :  { %v3193_v26 = vpop.eup %3192 }
 0x7bc   :  { %v1535_v63 = vsel %vm455_vm9, %v3193_v26, %v3953_v9 }
 0x7bd   :  { %2645 = vmatmul.mubr.f32.vlgmr.msra.gmra.mrb[16].mxu1 %v1535_v63 }
 0x872   :  { %v1711_v57 = vpop.f32.mrb[32].mxu0 }
 0x873   :  { %v2681_v37 = vpop.f32.mrb[33].mxu0 }
 0x890   :  { %v1641_v8 = vpop.f32.mrb[16].mxu1 }
 0x891   :  { %v1712_v5 = vadd.f32 %v1711_v57, %v1641_v8  ;;  %v2646_v22 = vpop.f32.mrb[17].mxu1 }
 0x893   :  { %v1722_v39 = vadd.f32 %v1745_v36, %v1712_v5 }
 0x895   :  { %1723 = vst [vmem:[#allocation11] sm:$0xff] %v1722_v39 }
 0x896   :  { %3315 = shalt.err (!%p3312_p2)
}
 0x897   :  { %s3316_s23 = scalar_lea.hbm %s4007_s10, 128 }
 0x898   :  { %p3317_p3 = scmp.ne.s32.totalorder %s4007_s10, %s3316_s23  ;;  %p3320_p4 = scmp.lt.u32.totalorder %s3316_s23, %s4007_s10 }
 0x89a   :  { %p3322_p5 = pnand %p3320_p4, %p3317_p3 }
 0x89c   :  { %3325 = shalt.err (!%p3322_p5)
}
 0x89d   :  { %1733 = dma.vmem_to_hbm [thread:$0]  %s1731_s3, 128, %s4007_s10, [#allocation4]  }
 0x89e   :  { %3332 = dma.done.wait [#allocation4], 128  }
 0x89f   :  { %3333 = vsyncadd [#allocation4], 4294967168 }
 0x8a0   :  { %1737 = vsyncpa [#allocation3], 1 }
 0x8a1   :  { %1738 = vsyncpa [#allocation6], 1 }
 0x8a2   :  { %1739 = vsyncpa [#allocation9], 1 }
 0x8a3   :  { %1740 = vsyncpa [#allocation4], 1 }

</bundles_post_ra>
